<compile_context>
chip_gen: v5e
topology: v5e:2x2
jax: 0.10.0
libtpu: 0.0.40
codegen_flags: <defaults>
</compile_context>

<pallas_src>
import functools
import math

import jax
import jax.numpy as jnp
from jax.experimental import pallas as pl
from jax.experimental.pallas import tpu as pltpu

_LN_EPS = 1e-5


def _gelu_tanh(x):
    # TODO(synk): PyTorch activation='gelu' is the exact erf GELU; the tanh approximation is
    # used here (max abs deviation ~3e-3); the reference below uses the same form.
    c = 0.7978845608028654  # sqrt(2/pi)
    return 0.5 * x * (1.0 + jnp.tanh(c * (x + 0.044715 * x * x * x)))


def _layer_norm(x, w, b, eps=_LN_EPS):
    inv_d = 1.0 / x.shape[-1]
    mu = jnp.sum(x, axis=-1, keepdims=True) * inv_d
    xc = x - mu
    var = jnp.sum(xc * xc, axis=-1, keepdims=True) * inv_d
    return xc * jax.lax.rsqrt(var + eps) * w + b


def _transformer_kernel(
    x_ref, pos_ref, win_ref, bin_ref,
    wqkv_ref, bqkv_ref, wout_ref, bout_ref,
    ln1w_ref, ln1b_ref, ln2w_ref, ln2b_ref,
    w1_ref, b1_ref, w2_ref, b2_ref,
    lnfw_ref, lnfb_ref,
    out_ref,
    h_ref,
    *, embed_dim: int, num_heads: int, batch_block: int, seq_len: int,
    seq_real: int, ff_chunk: int,
):
    layer = pl.program_id(1)
    num_layers = pl.num_programs(1)
    D = embed_dim
    H = num_heads
    hd = D // H
    Bt = batch_block
    S = seq_len                      # padded sequence length (multiple of 8)
    T = Bt * S
    F = w1_ref.shape[-1]
    scale = 1.0 / math.sqrt(hd)

    # ---- embedding: input projection + positional encoding (first layer step only) ----
    @pl.when(layer == 0)
    def _():
        x = x_ref[...].reshape(T, x_ref.shape[-1]).astype(jnp.bfloat16)
        h0 = jnp.dot(x, win_ref[...], preferred_element_type=jnp.float32) + bin_ref[...]
        h0 = (h0.reshape(Bt, S, D) + pos_ref[...][None, :, :]).reshape(T, D)
        h_ref[...] = h0

    h = h_ref[...]                                                       # (T, D) f32 residual

    # ---- self-attention block (post-norm) ----
    qkv = jnp.dot(h.astype(jnp.bfloat16), wqkv_ref[0],
                  preferred_element_type=jnp.float32) + bqkv_ref[0]      # (T, 3D) f32
    q = (qkv[:, 0:D] * scale).astype(jnp.bfloat16)
    k = qkv[:, D:2 * D].astype(jnp.bfloat16)
    v = qkv[:, 2 * D:3 * D].astype(jnp.bfloat16)

    kmask = None
    if seq_real != S:   # padded key positions must not receive attention mass
        kmask = jax.lax.broadcasted_iota(jnp.int32, (Bt, S, S), 2) < seq_real

    head_outs = []
    for hh in range(H):
        sl = slice(hh * hd, (hh + 1) * hd)
        qh = q[:, sl].reshape(Bt, S, hd)          # leading-dim reshapes only (S % 8 == 0)
        kh = k[:, sl].reshape(Bt, S, hd)
        vh = v[:, sl].reshape(Bt, S, hd)
        s = jax.lax.dot_general(qh, kh, (((2,), (2,)), ((0,), (0,))),
                                preferred_element_type=jnp.float32)       # (Bt, S, S)
        if kmask is not None:
            s = jnp.where(kmask, s, -1e30)
        s = s - jnp.max(s, axis=-1, keepdims=True)
        p = jnp.exp(s)
        p = p * pl.reciprocal(jnp.sum(p, axis=-1, keepdims=True), approx=True)
        oh = jax.lax.dot_general(p.astype(jnp.bfloat16), vh,
                                 (((2,), (1,)), ((0,), (0,))),
                                 preferred_element_type=jnp.float32)      # (Bt, S, hd)
        head_outs.append(oh.reshape(T, hd))
    attn = jnp.concatenate(head_outs, axis=-1)                            # (T, D) f32
    attn = jnp.dot(attn.astype(jnp.bfloat16), wout_ref[0],
                   preferred_element_type=jnp.float32) + bout_ref[0]

    h = _layer_norm(h + attn, ln1w_ref[0], ln1b_ref[0])

    # ---- feed-forward block (post-norm), chunked along F to bound the live intermediate ----
    hb = h.astype(jnp.bfloat16)
    ff = jnp.zeros((T, D), jnp.float32)
    for c0 in range(0, F, ff_chunk):
        c1 = min(F, c0 + ff_chunk)
        g = jnp.dot(hb, w1_ref[0, :, c0:c1],
                    preferred_element_type=jnp.float32) + b1_ref[0, :, c0:c1]
        g = _gelu_tanh(g).astype(jnp.bfloat16)
        ff = ff + jnp.dot(g, w2_ref[0, c0:c1, :], preferred_element_type=jnp.float32)
    ff = ff + b2_ref[0]
    h = _layer_norm(h + ff, ln2w_ref[0], ln2b_ref[0])

    h_ref[...] = h

    # ---- final LayerNorm + HBM writeback only on the last layer step ----
    @pl.when(layer == num_layers - 1)
    def _():
        y = _layer_norm(h, lnfw_ref[...], lnfb_ref[...])
        out_ref[...] = y.reshape(Bt, S, D).astype(out_ref.dtype)


def _pick_batch_block(B, S_pad, max_rows=512):
    """Largest divisor Bt of B with Bt*S_pad <= max_rows, keeping >=2 parallel grid steps."""
    best = 1
    for d in range(1, B + 1):
        if B % d:
            continue
        if d * S_pad > max_rows:
            continue
        if d != 1 and B // d < 2:   # keep both v7x TensorCores busy when B allows
            continue
        best = d
    return best


def temporal_transformer_forward(x, params, *, num_heads: int, batch_block=None):
    """Pallas implementation of TemporalTransformer.forward. x: (B, S, input_dim) -> (B, S, D)."""
    B, S, Din = x.shape
    D = params["win"].shape[1]
    L = params["wqkv"].shape[0]
    F = params["w1"].shape[2]
    assert D % num_heads == 0, (D, num_heads)

    # Pad sequence so the sublane dim is a multiple of 8 (padded keys are masked in-kernel).
    S_pad = ((S + 7) // 8) * 8
    x_p = x if S_pad == S else jnp.pad(x, ((0, 0), (0, S_pad - S), (0, 0)))

    pos = params["pos"][0, :min(S, params["pos"].shape[1]), :].astype(jnp.float32)
    if pos.shape[0] < S_pad:
        pos = jnp.pad(pos, ((0, S_pad - pos.shape[0]), (0, 0)))

    if batch_block is None:
        batch_block = _pick_batch_block(B, S_pad)
    assert B % batch_block == 0
    Bt = batch_block
    nB = B // Bt

    # Streamed matmul weights in bf16; biases / LayerNorm params / residual stream stay f32.
    bf16 = jnp.bfloat16
    win = params["win"].astype(bf16)
    wqkv = params["wqkv"].astype(bf16)
    wout = params["wout"].astype(bf16)
    w1 = params["w1"].astype(bf16)
    w2 = params["w2"].astype(bf16)

    ff_chunk = min(F, 512)

    kernel = functools.partial(
        _transformer_kernel, embed_dim=D, num_heads=num_heads, batch_block=Bt,
        seq_len=S_pad, seq_real=S, ff_chunk=ff_chunk)

    def nbytes(a):
        return int(a.size) * int(a.dtype.itemsize)

    streamed = (wqkv, params["bqkv"], wout, params["bout"],
                params["ln1w"], params["ln1b"], params["ln2w"], params["ln2b"],
                w1, params["b1"], w2, params["b2"])
    resident = (x_p, pos, win, params["bin"], params["lnfw"], params["lnfb"])

    flops = (2 * B * S_pad * Din * D
             + 2 * B * L * S_pad * (D * 3 * D + 2 * S_pad * D + D * D + 2 * D * F))
    transcendentals = B * L * (num_heads * S_pad * S_pad + S_pad * F)
    bytes_accessed = (sum(nbytes(a) for a in resident)
                      + nB * sum(nbytes(a) for a in streamed)      # weights streamed per batch block
                      + 4 * B * S_pad * D)                         # output writeback

    per_layer_bytes = sum(nbytes(a) // L for a in streamed)
    vmem_est = (2 * per_layer_bytes                    # double-buffered streamed weight block
                + 2 * (Bt * S_pad * Din * 4)           # x block
                + 2 * (Bt * S_pad * D * 4)             # out block
                + Bt * S_pad * D * 4                   # residual scratch
                + S_pad * D * 4 + Din * D * 2 + 6 * D * 4)
    vmem_limit = int(min(112 * 2 ** 20, max(32 * 2 ** 20, 2 * vmem_est)))

    grid_spec = pltpu.PrefetchScalarGridSpec(
        num_scalar_prefetch=0,
        grid=(nB, L),
        in_specs=[
            pl.BlockSpec((Bt, S_pad, Din), lambda b, l: (b, 0, 0)),   # x (resident over layers)
            pl.BlockSpec((S_pad, D), lambda b, l: (0, 0)),            # positional encoding
            pl.BlockSpec((Din, D), lambda b, l: (0, 0)),              # input projection weight
            pl.BlockSpec((1, D), lambda b, l: (0, 0)),                # input projection bias
            pl.BlockSpec((1, D, 3 * D), lambda b, l: (l, 0, 0)),      # streamed per-layer weights
            pl.BlockSpec((1, 1, 3 * D), lambda b, l: (l, 0, 0)),
            pl.BlockSpec((1, D, D), lambda b, l: (l, 0, 0)),
            pl.BlockSpec((1, 1, D), lambda b, l: (l, 0, 0)),
            pl.BlockSpec((1, 1, D), lambda b, l: (l, 0, 0)),          # ln1 w/b
            pl.BlockSpec((1, 1, D), lambda b, l: (l, 0, 0)),
            pl.BlockSpec((1, 1, D), lambda b, l: (l, 0, 0)),          # ln2 w/b
            pl.BlockSpec((1, 1, D), lambda b, l: (l, 0, 0)),
            pl.BlockSpec((1, D, F), lambda b, l: (l, 0, 0)),          # FFN linear1
            pl.BlockSpec((1, 1, F), lambda b, l: (l, 0, 0)),
            pl.BlockSpec((1, F, D), lambda b, l: (l, 0, 0)),          # FFN linear2
            pl.BlockSpec((1, 1, D), lambda b, l: (l, 0, 0)),
            pl.BlockSpec((1, D), lambda b, l: (0, 0)),                # final LayerNorm (resident)
            pl.BlockSpec((1, D), lambda b, l: (0, 0)),
        ],
        out_specs=pl.BlockSpec((Bt, S_pad, D), lambda b, l: (b, 0, 0)),
        scratch_shapes=[pltpu.VMEM((Bt * S_pad, D), jnp.float32)],
    )

    out = pl.pallas_call(
        kernel,
        out_shape=jax.ShapeDtypeStruct((B, S_pad, D), jnp.float32),
        grid_spec=grid_spec,
        compiler_params=pltpu.CompilerParams(
            dimension_semantics=("parallel", "arbitrary"),
            vmem_limit_bytes=vmem_limit,
        ),
        cost_estimate=pl.CostEstimate(flops=int(flops),
                                      transcendentals=int(transcendentals),
                                      bytes_accessed=int(bytes_accessed)),
    )(x_p, pos, win, params["bin"],
      wqkv, params["bqkv"], wout, params["bout"],
      params["ln1w"], params["ln1b"], params["ln2w"], params["ln2b"],
      w1, params["b1"], w2, params["b2"],
      params["lnfw"], params["lnfb"])

    return out if S_pad == S else out[:, :S, :]


def init_params(key, input_dim, embed_dim, num_layers, num_heads, max_len=100):
    D, L = embed_dim, num_layers
    F = 4 * D
    ks = jax.random.split(key, 10)

    def unif(k, fan_in, shape):
        bound = 1.0 / math.sqrt(fan_in)
        return jax.random.uniform(k, shape, jnp.float32, minval=-bound, maxval=bound)

    return dict(
        pos=0.02 * jax.random.normal(ks[0], (1, max_len, D), jnp.float32),
        win=unif(ks[1], input_dim, (input_dim, D)),
        bin=unif(ks[2], input_dim, (1, D)),
        wqkv=unif(ks[3], D, (L, D, 3 * D)),
        bqkv=jnp.zeros((L, 1, 3 * D), jnp.float32),
        wout=unif(ks[4], D, (L, D, D)),
        bout=unif(ks[5], D, (L, 1, D)),
        ln1w=jnp.ones((L, 1, D), jnp.float32),
        ln1b=jnp.zeros((L, 1, D), jnp.float32),
        ln2w=jnp.ones((L, 1, D), jnp.float32),
        ln2b=jnp.zeros((L, 1, D), jnp.float32),
        w1=unif(ks[6], D, (L, D, F)),
        b1=unif(ks[7], D, (L, 1, F)),
        w2=unif(ks[8], F, (L, F, D)),
        b2=unif(ks[9], F, (L, 1, D)),
        lnfw=jnp.ones((1, D), jnp.float32),
        lnfb=jnp.zeros((1, D), jnp.float32),
    )


def _reference_forward(x, params, *, num_heads: int):
    """Pure-JAX reference mirroring the kernel's mixed precision (bf16 MXU inputs, f32
    accumulation, f32 LayerNorm / residual stream) so the comparison checks kernel fidelity."""
    B, S, _ = x.shape
    D = params["win"].shape[1]
    hd = D // num_heads
    L = params["wqkv"].shape[0]
    bf16 = jnp.bfloat16

    def mm(a, b):
        return jnp.matmul(a.astype(bf16), b.astype(bf16), preferred_element_type=jnp.float32)

    h = mm(x, params["win"]) + params["bin"] + params["pos"][:, :S, :]
    for l in range(L):
        qkv = mm(h, params["wqkv"][l]) + params["bqkv"][l]
        q, k, v = jnp.split(qkv, 3, axis=-1)
        q = (q / math.sqrt(hd)).reshape(B, S, num_heads, hd).transpose(0, 2, 1, 3)
        k = k.reshape(B, S, num_heads, hd).transpose(0, 2, 1, 3)
        v = v.reshape(B, S, num_heads, hd).transpose(0, 2, 1, 3)
        s = jnp.einsum("bhqd,bhkd->bhqk", q.astype(bf16), k.astype(bf16),
                       preferred_element_type=jnp.float32)
        p = jax.nn.softmax(s, axis=-1)
        o = jnp.einsum("bhqk,bhkd->bhqd", p.astype(bf16), v.astype(bf16),
                       preferred_element_type=jnp.float32)
        o = o.transpose(0, 2, 1, 3).reshape(B, S, D)
        o = mm(o, params["wout"][l]) + params["bout"][l]
        h = _layer_norm(h + o, params["ln1w"][l], params["ln1b"][l])
        ff = mm(h, params["w1"][l]) + params["b1"][l]
        ff = _gelu_tanh(ff)
        ff = mm(ff, params["w2"][l]) + params["b2"][l]
        h = _layer_norm(h + ff, params["ln2w"][l], params["ln2b"][l])
    return _layer_norm(h, params["lnfw"], params["lnfb"])


if __name__ == "__main__":
    key = jax.random.PRNGKey(0)
    B, S, Din = 2, 8, 16          # batch, seq_len, input_dim
    D, L, H = 32, 3, 8            # embed_dim, num_layers, num_heads

    kp, kx = jax.random.split(key)
    params = init_params(kp, Din, D, L, H)
    x = jax.random.normal(kx, (B, S, Din), dtype=jnp.float32)

    out = jax.block_until_ready(temporal_transformer_forward(x, params, num_heads=H))
    ref = _reference_forward(x, params, num_heads=H)

    assert out.shape == (B, S, D), out.shape
    assert bool(jnp.all(jnp.isfinite(out)))
    max_err = float(jnp.max(jnp.abs(out - ref)))
    assert jnp.allclose(out, ref, rtol=2e-2, atol=2e-2), ("max_abs_err", max_err)

    print("KERNEL_OK")
</pallas_src>

<mosaic_0001>
module attributes {stable_mosaic.version = 11 : i64} {
  func.func @_transformer_kernel(%arg0: i32, %arg1: i32, %arg2: memref<1x8x16xf32, #tpu.memory_space<vmem>>, %arg3: memref<8x32xf32, #tpu.memory_space<vmem>>, %arg4: memref<16x32xbf16, #tpu.memory_space<vmem>>, %arg5: memref<1x32xf32, #tpu.memory_space<vmem>>, %arg6: memref<1x32x96xbf16, #tpu.memory_space<vmem>>, %arg7: memref<1x1x96xf32, #tpu.memory_space<vmem>>, %arg8: memref<1x32x32xbf16, #tpu.memory_space<vmem>>, %arg9: memref<1x1x32xf32, #tpu.memory_space<vmem>>, %arg10: memref<1x1x32xf32, #tpu.memory_space<vmem>>, %arg11: memref<1x1x32xf32, #tpu.memory_space<vmem>>, %arg12: memref<1x1x32xf32, #tpu.memory_space<vmem>>, %arg13: memref<1x1x32xf32, #tpu.memory_space<vmem>>, %arg14: memref<1x32x128xbf16, #tpu.memory_space<vmem>>, %arg15: memref<1x1x128xf32, #tpu.memory_space<vmem>>, %arg16: memref<1x128x32xbf16, #tpu.memory_space<vmem>>, %arg17: memref<1x1x32xf32, #tpu.memory_space<vmem>>, %arg18: memref<1x32xf32, #tpu.memory_space<vmem>>, %arg19: memref<1x32xf32, #tpu.memory_space<vmem>>, %arg20: memref<1x8x32xf32, #tpu.memory_space<vmem>>, %arg21: memref<8x32xf32, #tpu.memory_space<vmem>>) attributes {dimension_semantics = [#tpu.dimension_semantics<parallel>, #tpu.dimension_semantics<arbitrary>], iteration_bounds = array<i64: 2, 3>, scalar_prefetch = 0 : i64, scratch_operands = 1 : i64, tpu.core_type = #tpu.core_type<tc>, window_params = [{transform_indices = @transform_0, window_bounds = array<i64: 1, 8, 16>}, {pipeline_mode = #tpu.pipeline_mode<synchronous>, transform_indices = @transform_1, window_bounds = array<i64: 8, 32>}, {pipeline_mode = #tpu.pipeline_mode<synchronous>, transform_indices = @transform_2, window_bounds = array<i64: 16, 32>}, {pipeline_mode = #tpu.pipeline_mode<synchronous>, transform_indices = @transform_3, window_bounds = array<i64: 1, 32>}, {transform_indices = @transform_4, window_bounds = array<i64: 1, 32, 96>}, {transform_indices = @transform_5, window_bounds = array<i64: 1, 1, 96>}, {transform_indices = @transform_6, window_bounds = array<i64: 1, 32, 32>}, {transform_indices = @transform_7, window_bounds = array<i64: 1, 1, 32>}, {transform_indices = @transform_8, window_bounds = array<i64: 1, 1, 32>}, {transform_indices = @transform_9, window_bounds = array<i64: 1, 1, 32>}, {transform_indices = @transform_10, window_bounds = array<i64: 1, 1, 32>}, {transform_indices = @transform_11, window_bounds = array<i64: 1, 1, 32>}, {transform_indices = @transform_12, window_bounds = array<i64: 1, 32, 128>}, {transform_indices = @transform_13, window_bounds = array<i64: 1, 1, 128>}, {transform_indices = @transform_14, window_bounds = array<i64: 1, 128, 32>}, {transform_indices = @transform_15, window_bounds = array<i64: 1, 1, 32>}, {pipeline_mode = #tpu.pipeline_mode<synchronous>, transform_indices = @transform_16, window_bounds = array<i64: 1, 32>}, {pipeline_mode = #tpu.pipeline_mode<synchronous>, transform_indices = @transform_17, window_bounds = array<i64: 1, 32>}, {transform_indices = @transform_18, window_bounds = array<i64: 1, 8, 32>}]} {
    %c0_i32 = arith.constant 0 : i32
    %0 = arith.cmpi eq, %arg1, %c0_i32 : i32
    %1 = arith.extui %0 : i1 to i32
    %c0_i32_0 = arith.constant 0 : i32
    %2 = arith.cmpi ne, %1, %c0_i32_0 : i32
    scf.if %2 {
      %c0_92 = arith.constant 0 : index
      %c0_93 = arith.constant 0 : index
      %c0_94 = arith.constant 0 : index
      %274 = vector.load %arg2[%c0_92, %c0_93, %c0_94] : memref<1x8x16xf32, #tpu.memory_space<vmem>>, vector<1x8x16xf32>
      %275 = vector.shape_cast %274 : vector<1x8x16xf32> to vector<8x16xf32>
      %276 = arith.truncf %275 : vector<8x16xf32> to vector<8x16xbf16>
      %c0_95 = arith.constant 0 : index
      %c0_96 = arith.constant 0 : index
      %277 = vector.load %arg4[%c0_95, %c0_96] : memref<16x32xbf16, #tpu.memory_space<vmem>>, vector<16x32xbf16>
      %cst_97 = arith.constant dense<0.000000e+00> : vector<8x32xf32>
      %278 = tpu.matmul %276, %277, %cst_97 {dimension_numbers = #tpu.dot_dimension_numbers<[1], [0], [0], [1], [0, 0, 1, 1], [], []>} : vector<8x16xbf16>, vector<16x32xbf16>, vector<8x32xf32> -> vector<8x32xf32>
      %c0_98 = arith.constant 0 : index
      %c0_99 = arith.constant 0 : index
      %279 = vector.load %arg5[%c0_98, %c0_99] : memref<1x32xf32, #tpu.memory_space<vmem>>, vector<1x32xf32>
      %280 = vector.broadcast %279 : vector<1x32xf32> to vector<8x32xf32>
      %281 = arith.addf %278, %280 : vector<8x32xf32>
      %282 = vector.shape_cast %281 : vector<8x32xf32> to vector<1x8x32xf32>
      %c0_100 = arith.constant 0 : index
      %c0_101 = arith.constant 0 : index
      %283 = vector.load %arg3[%c0_100, %c0_101] : memref<8x32xf32, #tpu.memory_space<vmem>>, vector<8x32xf32>
      %284 = vector.shape_cast %283 : vector<8x32xf32> to vector<1x8x32xf32>
      %285 = arith.addf %282, %284 : vector<1x8x32xf32>
      %286 = vector.shape_cast %285 : vector<1x8x32xf32> to vector<8x32xf32>
      %c0_102 = arith.constant 0 : index
      %c0_103 = arith.constant 0 : index
      %287 = vector.load %arg21[%c0_102, %c0_103] : memref<8x32xf32, #tpu.memory_space<vmem>>, vector<8x32xf32>
      tpu.vector_store %arg21[%c0_102, %c0_103], %286 {strides = array<i32>} : memref<8x32xf32, #tpu.memory_space<vmem>>, vector<8x32xf32>,
    } else {
    }
    %c0 = arith.constant 0 : index
    %c0_1 = arith.constant 0 : index
    %3 = vector.load %arg21[%c0, %c0_1] : memref<8x32xf32, #tpu.memory_space<vmem>>, vector<8x32xf32>
    %4 = arith.truncf %3 : vector<8x32xf32> to vector<8x32xbf16>
    %c0_2 = arith.constant 0 : index
    %c0_3 = arith.constant 0 : index
    %c0_4 = arith.constant 0 : index
    %5 = vector.load %arg6[%c0_2, %c0_3, %c0_4] : memref<1x32x96xbf16, #tpu.memory_space<vmem>>, vector<1x32x96xbf16>
    %6 = vector.shape_cast %5 : vector<1x32x96xbf16> to vector<32x96xbf16>
    %cst = arith.constant dense<0.000000e+00> : vector<8x96xf32>
    %7 = tpu.matmul %4, %6, %cst {dimension_numbers = #tpu.dot_dimension_numbers<[1], [0], [0], [1], [0, 0, 1, 1], [], []>} : vector<8x32xbf16>, vector<32x96xbf16>, vector<8x96xf32> -> vector<8x96xf32>
    %c0_5 = arith.constant 0 : index
    %c0_6 = arith.constant 0 : index
    %c0_7 = arith.constant 0 : index
    %8 = vector.load %arg7[%c0_5, %c0_6, %c0_7] : memref<1x1x96xf32, #tpu.memory_space<vmem>>, vector<1x1x96xf32>
    %9 = vector.shape_cast %8 : vector<1x1x96xf32> to vector<1x96xf32>
    %10 = vector.broadcast %9 : vector<1x96xf32> to vector<8x96xf32>
    %11 = arith.addf %7, %10 : vector<8x96xf32>
    %12 = vector.extract_strided_slice %11 {offsets = [0, 0], sizes = [8, 32], strides = [1, 1]} : vector<8x96xf32> to vector<8x32xf32>
    %cst_8 = arith.constant 5.000000e-01 : f32
    %13 = vector.broadcast %cst_8 : f32 to vector<8x32xf32>
    %14 = arith.mulf %12, %13 : vector<8x32xf32>
    %15 = arith.truncf %14 : vector<8x32xf32> to vector<8x32xbf16>
    %16 = vector.extract_strided_slice %11 {offsets = [0, 32], sizes = [8, 32], strides = [1, 1]} : vector<8x96xf32> to vector<8x32xf32>
    %17 = arith.truncf %16 : vector<8x32xf32> to vector<8x32xbf16>
    %18 = vector.extract_strided_slice %11 {offsets = [0, 64], sizes = [8, 32], strides = [1, 1]} : vector<8x96xf32> to vector<8x32xf32>
    %19 = arith.truncf %18 : vector<8x32xf32> to vector<8x32xbf16>
    %20 = vector.extract_strided_slice %15 {offsets = [0, 0], sizes = [8, 4], strides = [1, 1]} : vector<8x32xbf16> to vector<8x4xbf16>
    %21 = vector.shape_cast %20 : vector<8x4xbf16> to vector<1x8x4xbf16>
    %22 = vector.extract_strided_slice %17 {offsets = [0, 0], sizes = [8, 4], strides = [1, 1]} : vector<8x32xbf16> to vector<8x4xbf16>
    %23 = vector.shape_cast %22 : vector<8x4xbf16> to vector<1x8x4xbf16>
    %24 = vector.extract_strided_slice %19 {offsets = [0, 0], sizes = [8, 4], strides = [1, 1]} : vector<8x32xbf16> to vector<8x4xbf16>
    %25 = vector.shape_cast %24 : vector<8x4xbf16> to vector<1x8x4xbf16>
    %cst_9 = arith.constant dense<0.000000e+00> : vector<1x8x8xf32>
    %26 = tpu.matmul %21, %23, %cst_9 {dimension_numbers = #tpu.dot_dimension_numbers<[2], [2], [1], [1], [0, 0, 0, 1, 1, 1], [0], [0]>} : vector<1x8x4xbf16>, vector<1x8x4xbf16>, vector<1x8x8xf32> -> vector<1x8x8xf32>
    %cst_10 = arith.constant dense<0xFF800000> : vector<1x8xf32>
    %27 = vector.multi_reduction <maximumf>, %26, %cst_10 [2] : vector<1x8x8xf32> to vector<1x8xf32>
    %28 = vector.shape_cast %27 : vector<1x8xf32> to vector<1x8x1xf32>
    %29 = vector.broadcast %28 : vector<1x8x1xf32> to vector<1x8x8xf32>
    %30 = arith.subf %26, %29 : vector<1x8x8xf32>
    %31 = math.exp %30 : vector<1x8x8xf32>
    %cst_11 = arith.constant dense<0.000000e+00> : vector<1x8xf32>
    %32 = vector.multi_reduction <add>, %31, %cst_11 [2] : vector<1x8x8xf32> to vector<1x8xf32>
    %33 = vector.shape_cast %32 : vector<1x8xf32> to vector<1x8x1xf32>
    %34 = tpu.reciprocal %33 {approx = true} : vector<1x8x1xf32> -> vector<1x8x1xf32>
    %35 = vector.broadcast %34 : vector<1x8x1xf32> to vector<1x8x8xf32>
    %36 = arith.mulf %31, %35 : vector<1x8x8xf32>
    %37 = arith.truncf %36 : vector<1x8x8xf32> to vector<1x8x8xbf16>
    %cst_12 = arith.constant dense<0.000000e+00> : vector<1x8x4xf32>
    %38 = tpu.matmul %37, %25, %cst_12 {dimension_numbers = #tpu.dot_dimension_numbers<[2], [1], [1], [2], [0, 0, 0, 1, 1, 2], [0], [0]>} : vector<1x8x8xbf16>, vector<1x8x4xbf16>, vector<1x8x4xf32> -> vector<1x8x4xf32>
    %39 = vector.shape_cast %38 : vector<1x8x4xf32> to vector<8x4xf32>
    %40 = vector.extract_strided_slice %15 {offsets = [0, 4], sizes = [8, 4], strides = [1, 1]} : vector<8x32xbf16> to vector<8x4xbf16>
    %41 = vector.shape_cast %40 : vector<8x4xbf16> to vector<1x8x4xbf16>
    %42 = vector.extract_strided_slice %17 {offsets = [0, 4], sizes = [8, 4], strides = [1, 1]} : vector<8x32xbf16> to vector<8x4xbf16>
    %43 = vector.shape_cast %42 : vector<8x4xbf16> to vector<1x8x4xbf16>
    %44 = vector.extract_strided_slice %19 {offsets = [0, 4], sizes = [8, 4], strides = [1, 1]} : vector<8x32xbf16> to vector<8x4xbf16>
    %45 = vector.shape_cast %44 : vector<8x4xbf16> to vector<1x8x4xbf16>
    %cst_13 = arith.constant dense<0.000000e+00> : vector<1x8x8xf32>
    %46 = tpu.matmul %41, %43, %cst_13 {dimension_numbers = #tpu.dot_dimension_numbers<[2], [2], [1], [1], [0, 0, 0, 1, 1, 1], [0], [0]>} : vector<1x8x4xbf16>, vector<1x8x4xbf16>, vector<1x8x8xf32> -> vector<1x8x8xf32>
    %cst_14 = arith.constant dense<0xFF800000> : vector<1x8xf32>
    %47 = vector.multi_reduction <maximumf>, %46, %cst_14 [2] : vector<1x8x8xf32> to vector<1x8xf32>
    %48 = vector.shape_cast %47 : vector<1x8xf32> to vector<1x8x1xf32>
    %49 = vector.broadcast %48 : vector<1x8x1xf32> to vector<1x8x8xf32>
    %50 = arith.subf %46, %49 : vector<1x8x8xf32>
    %51 = math.exp %50 : vector<1x8x8xf32>
    %cst_15 = arith.constant dense<0.000000e+00> : vector<1x8xf32>
    %52 = vector.multi_reduction <add>, %51, %cst_15 [2] : vector<1x8x8xf32> to vector<1x8xf32>
    %53 = vector.shape_cast %52 : vector<1x8xf32> to vector<1x8x1xf32>
    %54 = tpu.reciprocal %53 {approx = true} : vector<1x8x1xf32> -> vector<1x8x1xf32>
    %55 = vector.broadcast %54 : vector<1x8x1xf32> to vector<1x8x8xf32>
    %56 = arith.mulf %51, %55 : vector<1x8x8xf32>
    %57 = arith.truncf %56 : vector<1x8x8xf32> to vector<1x8x8xbf16>
    %cst_16 = arith.constant dense<0.000000e+00> : vector<1x8x4xf32>
    %58 = tpu.matmul %57, %45, %cst_16 {dimension_numbers = #tpu.dot_dimension_numbers<[2], [1], [1], [2], [0, 0, 0, 1, 1, 2], [0], [0]>} : vector<1x8x8xbf16>, vector<1x8x4xbf16>, vector<1x8x4xf32> -> vector<1x8x4xf32>
    %59 = vector.shape_cast %58 : vector<1x8x4xf32> to vector<8x4xf32>
    %60 = vector.extract_strided_slice %15 {offsets = [0, 8], sizes = [8, 4], strides = [1, 1]} : vector<8x32xbf16> to vector<8x4xbf16>
    %61 = vector.shape_cast %60 : vector<8x4xbf16> to vector<1x8x4xbf16>
    %62 = vector.extract_strided_slice %17 {offsets = [0, 8], sizes = [8, 4], strides = [1, 1]} : vector<8x32xbf16> to vector<8x4xbf16>
    %63 = vector.shape_cast %62 : vector<8x4xbf16> to vector<1x8x4xbf16>
    %64 = vector.extract_strided_slice %19 {offsets = [0, 8], sizes = [8, 4], strides = [1, 1]} : vector<8x32xbf16> to vector<8x4xbf16>
    %65 = vector.shape_cast %64 : vector<8x4xbf16> to vector<1x8x4xbf16>
    %cst_17 = arith.constant dense<0.000000e+00> : vector<1x8x8xf32>
    %66 = tpu.matmul %61, %63, %cst_17 {dimension_numbers = #tpu.dot_dimension_numbers<[2], [2], [1], [1], [0, 0, 0, 1, 1, 1], [0], [0]>} : vector<1x8x4xbf16>, vector<1x8x4xbf16>, vector<1x8x8xf32> -> vector<1x8x8xf32>
    %cst_18 = arith.constant dense<0xFF800000> : vector<1x8xf32>
    %67 = vector.multi_reduction <maximumf>, %66, %cst_18 [2] : vector<1x8x8xf32> to vector<1x8xf32>
    %68 = vector.shape_cast %67 : vector<1x8xf32> to vector<1x8x1xf32>
    %69 = vector.broadcast %68 : vector<1x8x1xf32> to vector<1x8x8xf32>
    %70 = arith.subf %66, %69 : vector<1x8x8xf32>
    %71 = math.exp %70 : vector<1x8x8xf32>
    %cst_19 = arith.constant dense<0.000000e+00> : vector<1x8xf32>
    %72 = vector.multi_reduction <add>, %71, %cst_19 [2] : vector<1x8x8xf32> to vector<1x8xf32>
    %73 = vector.shape_cast %72 : vector<1x8xf32> to vector<1x8x1xf32>
    %74 = tpu.reciprocal %73 {approx = true} : vector<1x8x1xf32> -> vector<1x8x1xf32>
    %75 = vector.broadcast %74 : vector<1x8x1xf32> to vector<1x8x8xf32>
    %76 = arith.mulf %71, %75 : vector<1x8x8xf32>
    %77 = arith.truncf %76 : vector<1x8x8xf32> to vector<1x8x8xbf16>
    %cst_20 = arith.constant dense<0.000000e+00> : vector<1x8x4xf32>
    %78 = tpu.matmul %77, %65, %cst_20 {dimension_numbers = #tpu.dot_dimension_numbers<[2], [1], [1], [2], [0, 0, 0, 1, 1, 2], [0], [0]>} : vector<1x8x8xbf16>, vector<1x8x4xbf16>, vector<1x8x4xf32> -> vector<1x8x4xf32>
    %79 = vector.shape_cast %78 : vector<1x8x4xf32> to vector<8x4xf32>
    %80 = vector.extract_strided_slice %15 {offsets = [0, 12], sizes = [8, 4], strides = [1, 1]} : vector<8x32xbf16> to vector<8x4xbf16>
    %81 = vector.shape_cast %80 : vector<8x4xbf16> to vector<1x8x4xbf16>
    %82 = vector.extract_strided_slice %17 {offsets = [0, 12], sizes = [8, 4], strides = [1, 1]} : vector<8x32xbf16> to vector<8x4xbf16>
    %83 = vector.shape_cast %82 : vector<8x4xbf16> to vector<1x8x4xbf16>
    %84 = vector.extract_strided_slice %19 {offsets = [0, 12], sizes = [8, 4], strides = [1, 1]} : vector<8x32xbf16> to vector<8x4xbf16>
    %85 = vector.shape_cast %84 : vector<8x4xbf16> to vector<1x8x4xbf16>
    %cst_21 = arith.constant dense<0.000000e+00> : vector<1x8x8xf32>
    %86 = tpu.matmul %81, %83, %cst_21 {dimension_numbers = #tpu.dot_dimension_numbers<[2], [2], [1], [1], [0, 0, 0, 1, 1, 1], [0], [0]>} : vector<1x8x4xbf16>, vector<1x8x4xbf16>, vector<1x8x8xf32> -> vector<1x8x8xf32>
    %cst_22 = arith.constant dense<0xFF800000> : vector<1x8xf32>
    %87 = vector.multi_reduction <maximumf>, %86, %cst_22 [2] : vector<1x8x8xf32> to vector<1x8xf32>
    %88 = vector.shape_cast %87 : vector<1x8xf32> to vector<1x8x1xf32>
    %89 = vector.broadcast %88 : vector<1x8x1xf32> to vector<1x8x8xf32>
    %90 = arith.subf %86, %89 : vector<1x8x8xf32>
    %91 = math.exp %90 : vector<1x8x8xf32>
    %cst_23 = arith.constant dense<0.000000e+00> : vector<1x8xf32>
    %92 = vector.multi_reduction <add>, %91, %cst_23 [2] : vector<1x8x8xf32> to vector<1x8xf32>
    %93 = vector.shape_cast %92 : vector<1x8xf32> to vector<1x8x1xf32>
    %94 = tpu.reciprocal %93 {approx = true} : vector<1x8x1xf32> -> vector<1x8x1xf32>
    %95 = vector.broadcast %94 : vector<1x8x1xf32> to vector<1x8x8xf32>
    %96 = arith.mulf %91, %95 : vector<1x8x8xf32>
    %97 = arith.truncf %96 : vector<1x8x8xf32> to vector<1x8x8xbf16>
    %cst_24 = arith.constant dense<0.000000e+00> : vector<1x8x4xf32>
    %98 = tpu.matmul %97, %85, %cst_24 {dimension_numbers = #tpu.dot_dimension_numbers<[2], [1], [1], [2], [0, 0, 0, 1, 1, 2], [0], [0]>} : vector<1x8x8xbf16>, vector<1x8x4xbf16>, vector<1x8x4xf32> -> vector<1x8x4xf32>
    %99 = vector.shape_cast %98 : vector<1x8x4xf32> to vector<8x4xf32>
    %100 = vector.extract_strided_slice %15 {offsets = [0, 16], sizes = [8, 4], strides = [1, 1]} : vector<8x32xbf16> to vector<8x4xbf16>
    %101 = vector.shape_cast %100 : vector<8x4xbf16> to vector<1x8x4xbf16>
    %102 = vector.extract_strided_slice %17 {offsets = [0, 16], sizes = [8, 4], strides = [1, 1]} : vector<8x32xbf16> to vector<8x4xbf16>
    %103 = vector.shape_cast %102 : vector<8x4xbf16> to vector<1x8x4xbf16>
    %104 = vector.extract_strided_slice %19 {offsets = [0, 16], sizes = [8, 4], strides = [1, 1]} : vector<8x32xbf16> to vector<8x4xbf16>
    %105 = vector.shape_cast %104 : vector<8x4xbf16> to vector<1x8x4xbf16>
    %cst_25 = arith.constant dense<0.000000e+00> : vector<1x8x8xf32>
    %106 = tpu.matmul %101, %103, %cst_25 {dimension_numbers = #tpu.dot_dimension_numbers<[2], [2], [1], [1], [0, 0, 0, 1, 1, 1], [0], [0]>} : vector<1x8x4xbf16>, vector<1x8x4xbf16>, vector<1x8x8xf32> -> vector<1x8x8xf32>
    %cst_26 = arith.constant dense<0xFF800000> : vector<1x8xf32>
    %107 = vector.multi_reduction <maximumf>, %106, %cst_26 [2] : vector<1x8x8xf32> to vector<1x8xf32>
    %108 = vector.shape_cast %107 : vector<1x8xf32> to vector<1x8x1xf32>
    %109 = vector.broadcast %108 : vector<1x8x1xf32> to vector<1x8x8xf32>
    %110 = arith.subf %106, %109 : vector<1x8x8xf32>
    %111 = math.exp %110 : vector<1x8x8xf32>
    %cst_27 = arith.constant dense<0.000000e+00> : vector<1x8xf32>
    %112 = vector.multi_reduction <add>, %111, %cst_27 [2] : vector<1x8x8xf32> to vector<1x8xf32>
    %113 = vector.shape_cast %112 : vector<1x8xf32> to vector<1x8x1xf32>
    %114 = tpu.reciprocal %113 {approx = true} : vector<1x8x1xf32> -> vector<1x8x1xf32>
    %115 = vector.broadcast %114 : vector<1x8x1xf32> to vector<1x8x8xf32>
    %116 = arith.mulf %111, %115 : vector<1x8x8xf32>
    %117 = arith.truncf %116 : vector<1x8x8xf32> to vector<1x8x8xbf16>
    %cst_28 = arith.constant dense<0.000000e+00> : vector<1x8x4xf32>
    %118 = tpu.matmul %117, %105, %cst_28 {dimension_numbers = #tpu.dot_dimension_numbers<[2], [1], [1], [2], [0, 0, 0, 1, 1, 2], [0], [0]>} : vector<1x8x8xbf16>, vector<1x8x4xbf16>, vector<1x8x4xf32> -> vector<1x8x4xf32>
    %119 = vector.shape_cast %118 : vector<1x8x4xf32> to vector<8x4xf32>
    %120 = vector.extract_strided_slice %15 {offsets = [0, 20], sizes = [8, 4], strides = [1, 1]} : vector<8x32xbf16> to vector<8x4xbf16>
    %121 = vector.shape_cast %120 : vector<8x4xbf16> to vector<1x8x4xbf16>
    %122 = vector.extract_strided_slice %17 {offsets = [0, 20], sizes = [8, 4], strides = [1, 1]} : vector<8x32xbf16> to vector<8x4xbf16>
    %123 = vector.shape_cast %122 : vector<8x4xbf16> to vector<1x8x4xbf16>
    %124 = vector.extract_strided_slice %19 {offsets = [0, 20], sizes = [8, 4], strides = [1, 1]} : vector<8x32xbf16> to vector<8x4xbf16>
    %125 = vector.shape_cast %124 : vector<8x4xbf16> to vector<1x8x4xbf16>
    %cst_29 = arith.constant dense<0.000000e+00> : vector<1x8x8xf32>
    %126 = tpu.matmul %121, %123, %cst_29 {dimension_numbers = #tpu.dot_dimension_numbers<[2], [2], [1], [1], [0, 0, 0, 1, 1, 1], [0], [0]>} : vector<1x8x4xbf16>, vector<1x8x4xbf16>, vector<1x8x8xf32> -> vector<1x8x8xf32>
    %cst_30 = arith.constant dense<0xFF800000> : vector<1x8xf32>
    %127 = vector.multi_reduction <maximumf>, %126, %cst_30 [2] : vector<1x8x8xf32> to vector<1x8xf32>
    %128 = vector.shape_cast %127 : vector<1x8xf32> to vector<1x8x1xf32>
    %129 = vector.broadcast %128 : vector<1x8x1xf32> to vector<1x8x8xf32>
    %130 = arith.subf %126, %129 : vector<1x8x8xf32>
    %131 = math.exp %130 : vector<1x8x8xf32>
    %cst_31 = arith.constant dense<0.000000e+00> : vector<1x8xf32>
    %132 = vector.multi_reduction <add>, %131, %cst_31 [2] : vector<1x8x8xf32> to vector<1x8xf32>
    %133 = vector.shape_cast %132 : vector<1x8xf32> to vector<1x8x1xf32>
    %134 = tpu.reciprocal %133 {approx = true} : vector<1x8x1xf32> -> vector<1x8x1xf32>
    %135 = vector.broadcast %134 : vector<1x8x1xf32> to vector<1x8x8xf32>
    %136 = arith.mulf %131, %135 : vector<1x8x8xf32>
    %137 = arith.truncf %136 : vector<1x8x8xf32> to vector<1x8x8xbf16>
    %cst_32 = arith.constant dense<0.000000e+00> : vector<1x8x4xf32>
    %138 = tpu.matmul %137, %125, %cst_32 {dimension_numbers = #tpu.dot_dimension_numbers<[2], [1], [1], [2], [0, 0, 0, 1, 1, 2], [0], [0]>} : vector<1x8x8xbf16>, vector<1x8x4xbf16>, vector<1x8x4xf32> -> vector<1x8x4xf32>
    %139 = vector.shape_cast %138 : vector<1x8x4xf32> to vector<8x4xf32>
    %140 = vector.extract_strided_slice %15 {offsets = [0, 24], sizes = [8, 4], strides = [1, 1]} : vector<8x32xbf16> to vector<8x4xbf16>
    %141 = vector.shape_cast %140 : vector<8x4xbf16> to vector<1x8x4xbf16>
    %142 = vector.extract_strided_slice %17 {offsets = [0, 24], sizes = [8, 4], strides = [1, 1]} : vector<8x32xbf16> to vector<8x4xbf16>
    %143 = vector.shape_cast %142 : vector<8x4xbf16> to vector<1x8x4xbf16>
    %144 = vector.extract_strided_slice %19 {offsets = [0, 24], sizes = [8, 4], strides = [1, 1]} : vector<8x32xbf16> to vector<8x4xbf16>
    %145 = vector.shape_cast %144 : vector<8x4xbf16> to vector<1x8x4xbf16>
    %cst_33 = arith.constant dense<0.000000e+00> : vector<1x8x8xf32>
    %146 = tpu.matmul %141, %143, %cst_33 {dimension_numbers = #tpu.dot_dimension_numbers<[2], [2], [1], [1], [0, 0, 0, 1, 1, 1], [0], [0]>} : vector<1x8x4xbf16>, vector<1x8x4xbf16>, vector<1x8x8xf32> -> vector<1x8x8xf32>
    %cst_34 = arith.constant dense<0xFF800000> : vector<1x8xf32>
    %147 = vector.multi_reduction <maximumf>, %146, %cst_34 [2] : vector<1x8x8xf32> to vector<1x8xf32>
    %148 = vector.shape_cast %147 : vector<1x8xf32> to vector<1x8x1xf32>
    %149 = vector.broadcast %148 : vector<1x8x1xf32> to vector<1x8x8xf32>
    %150 = arith.subf %146, %149 : vector<1x8x8xf32>
    %151 = math.exp %150 : vector<1x8x8xf32>
    %cst_35 = arith.constant dense<0.000000e+00> : vector<1x8xf32>
    %152 = vector.multi_reduction <add>, %151, %cst_35 [2] : vector<1x8x8xf32> to vector<1x8xf32>
    %153 = vector.shape_cast %152 : vector<1x8xf32> to vector<1x8x1xf32>
    %154 = tpu.reciprocal %153 {approx = true} : vector<1x8x1xf32> -> vector<1x8x1xf32>
    %155 = vector.broadcast %154 : vector<1x8x1xf32> to vector<1x8x8xf32>
    %156 = arith.mulf %151, %155 : vector<1x8x8xf32>
    %157 = arith.truncf %156 : vector<1x8x8xf32> to vector<1x8x8xbf16>
    %cst_36 = arith.constant dense<0.000000e+00> : vector<1x8x4xf32>
    %158 = tpu.matmul %157, %145, %cst_36 {dimension_numbers = #tpu.dot_dimension_numbers<[2], [1], [1], [2], [0, 0, 0, 1, 1, 2], [0], [0]>} : vector<1x8x8xbf16>, vector<1x8x4xbf16>, vector<1x8x4xf32> -> vector<1x8x4xf32>
    %159 = vector.shape_cast %158 : vector<1x8x4xf32> to vector<8x4xf32>
    %160 = vector.extract_strided_slice %15 {offsets = [0, 28], sizes = [8, 4], strides = [1, 1]} : vector<8x32xbf16> to vector<8x4xbf16>
    %161 = vector.shape_cast %160 : vector<8x4xbf16> to vector<1x8x4xbf16>
    %162 = vector.extract_strided_slice %17 {offsets = [0, 28], sizes = [8, 4], strides = [1, 1]} : vector<8x32xbf16> to vector<8x4xbf16>
    %163 = vector.shape_cast %162 : vector<8x4xbf16> to vector<1x8x4xbf16>
    %164 = vector.extract_strided_slice %19 {offsets = [0, 28], sizes = [8, 4], strides = [1, 1]} : vector<8x32xbf16> to vector<8x4xbf16>
    %165 = vector.shape_cast %164 : vector<8x4xbf16> to vector<1x8x4xbf16>
    %cst_37 = arith.constant dense<0.000000e+00> : vector<1x8x8xf32>
    %166 = tpu.matmul %161, %163, %cst_37 {dimension_numbers = #tpu.dot_dimension_numbers<[2], [2], [1], [1], [0, 0, 0, 1, 1, 1], [0], [0]>} : vector<1x8x4xbf16>, vector<1x8x4xbf16>, vector<1x8x8xf32> -> vector<1x8x8xf32>
    %cst_38 = arith.constant dense<0xFF800000> : vector<1x8xf32>
    %167 = vector.multi_reduction <maximumf>, %166, %cst_38 [2] : vector<1x8x8xf32> to vector<1x8xf32>
    %168 = vector.shape_cast %167 : vector<1x8xf32> to vector<1x8x1xf32>
    %169 = vector.broadcast %168 : vector<1x8x1xf32> to vector<1x8x8xf32>
    %170 = arith.subf %166, %169 : vector<1x8x8xf32>
    %171 = math.exp %170 : vector<1x8x8xf32>
    %cst_39 = arith.constant dense<0.000000e+00> : vector<1x8xf32>
    %172 = vector.multi_reduction <add>, %171, %cst_39 [2] : vector<1x8x8xf32> to vector<1x8xf32>
    %173 = vector.shape_cast %172 : vector<1x8xf32> to vector<1x8x1xf32>
    %174 = tpu.reciprocal %173 {approx = true} : vector<1x8x1xf32> -> vector<1x8x1xf32>
    %175 = vector.broadcast %174 : vector<1x8x1xf32> to vector<1x8x8xf32>
    %176 = arith.mulf %171, %175 : vector<1x8x8xf32>
    %177 = arith.truncf %176 : vector<1x8x8xf32> to vector<1x8x8xbf16>
    %cst_40 = arith.constant dense<0.000000e+00> : vector<1x8x4xf32>
    %178 = tpu.matmul %177, %165, %cst_40 {dimension_numbers = #tpu.dot_dimension_numbers<[2], [1], [1], [2], [0, 0, 0, 1, 1, 2], [0], [0]>} : vector<1x8x8xbf16>, vector<1x8x4xbf16>, vector<1x8x4xf32> -> vector<1x8x4xf32>
    %179 = vector.shape_cast %178 : vector<1x8x4xf32> to vector<8x4xf32>
    %180 = tpu.concatenate %39, %59, %79, %99, %119, %139, %159, %179 in 1 : vector<8x4xf32>, vector<8x4xf32>, vector<8x4xf32>, vector<8x4xf32>, vector<8x4xf32>, vector<8x4xf32>, vector<8x4xf32>, vector<8x4xf32> -> vector<8x32xf32>
    %181 = arith.truncf %180 : vector<8x32xf32> to vector<8x32xbf16>
    %c0_41 = arith.constant 0 : index
    %c0_42 = arith.constant 0 : index
    %c0_43 = arith.constant 0 : index
    %182 = vector.load %arg8[%c0_41, %c0_42, %c0_43] : memref<1x32x32xbf16, #tpu.memory_space<vmem>>, vector<1x32x32xbf16>
    %183 = vector.shape_cast %182 : vector<1x32x32xbf16> to vector<32x32xbf16>
    %cst_44 = arith.constant dense<0.000000e+00> : vector<8x32xf32>
    %184 = tpu.matmul %181, %183, %cst_44 {dimension_numbers = #tpu.dot_dimension_numbers<[1], [0], [0], [1], [0, 0, 1, 1], [], []>} : vector<8x32xbf16>, vector<32x32xbf16>, vector<8x32xf32> -> vector<8x32xf32>
    %c0_45 = arith.constant 0 : index
    %c0_46 = arith.constant 0 : index
    %c0_47 = arith.constant 0 : index
    %185 = vector.load %arg9[%c0_45, %c0_46, %c0_47] : memref<1x1x32xf32, #tpu.memory_space<vmem>>, vector<1x1x32xf32>
    %186 = vector.shape_cast %185 : vector<1x1x32xf32> to vector<1x32xf32>
    %187 = vector.broadcast %186 : vector<1x32xf32> to vector<8x32xf32>
    %188 = arith.addf %184, %187 : vector<8x32xf32>
    %189 = arith.addf %3, %188 : vector<8x32xf32>
    %c0_48 = arith.constant 0 : index
    %c0_49 = arith.constant 0 : index
    %c0_50 = arith.constant 0 : index
    %190 = vector.load %arg10[%c0_48, %c0_49, %c0_50] : memref<1x1x32xf32, #tpu.memory_space<vmem>>, vector<1x1x32xf32>
    %191 = vector.shape_cast %190 : vector<1x1x32xf32> to vector<1x32xf32>
    %c0_51 = arith.constant 0 : index
    %c0_52 = arith.constant 0 : index
    %c0_53 = arith.constant 0 : index
    %192 = vector.load %arg11[%c0_51, %c0_52, %c0_53] : memref<1x1x32xf32, #tpu.memory_space<vmem>>, vector<1x1x32xf32>
    %193 = vector.shape_cast %192 : vector<1x1x32xf32> to vector<1x32xf32>
    %cst_54 = arith.constant dense<0.000000e+00> : vector<8xf32>
    %194 = vector.multi_reduction <add>, %189, %cst_54 [1] : vector<8x32xf32> to vector<8xf32>
    %195 = vector.shape_cast %194 : vector<8xf32> to vector<8x1xf32>
    %cst_55 = arith.constant 3.125000e-02 : f32
    %196 = vector.broadcast %cst_55 : f32 to vector<8x1xf32>
    %197 = arith.mulf %195, %196 : vector<8x1xf32>
    %198 = vector.broadcast %197 : vector<8x1xf32> to vector<8x32xf32>
    %199 = arith.subf %189, %198 : vector<8x32xf32>
    %200 = arith.mulf %199, %199 : vector<8x32xf32>
    %cst_56 = arith.constant dense<0.000000e+00> : vector<8xf32>
    %201 = vector.multi_reduction <add>, %200, %cst_56 [1] : vector<8x32xf32> to vector<8xf32>
    %202 = vector.shape_cast %201 : vector<8xf32> to vector<8x1xf32>
    %cst_57 = arith.constant 3.125000e-02 : f32
    %203 = vector.broadcast %cst_57 : f32 to vector<8x1xf32>
    %204 = arith.mulf %202, %203 : vector<8x1xf32>
    %cst_58 = arith.constant 9.99999974E-6 : f32
    %205 = vector.broadcast %cst_58 : f32 to vector<8x1xf32>
    %206 = arith.addf %204, %205 : vector<8x1xf32>
    %207 = math.rsqrt %206 : vector<8x1xf32>
    %208 = vector.broadcast %207 : vector<8x1xf32> to vector<8x32xf32>
    %209 = arith.mulf %199, %208 : vector<8x32xf32>
    %210 = vector.broadcast %191 : vector<1x32xf32> to vector<8x32xf32>
    %211 = arith.mulf %209, %210 : vector<8x32xf32>
    %212 = vector.broadcast %193 : vector<1x32xf32> to vector<8x32xf32>
    %213 = arith.addf %211, %212 : vector<8x32xf32>
    %214 = arith.truncf %213 : vector<8x32xf32> to vector<8x32xbf16>
    %cst_59 = arith.constant 0.000000e+00 : f32
    %215 = vector.broadcast %cst_59 : f32 to vector<8x32xf32>
    %c0_60 = arith.constant 0 : index
    %c0_61 = arith.constant 0 : index
    %c0_62 = arith.constant 0 : index
    %216 = vector.load %arg14[%c0_60, %c0_61, %c0_62] : memref<1x32x128xbf16, #tpu.memory_space<vmem>>, vector<1x32x128xbf16>
    %217 = vector.shape_cast %216 : vector<1x32x128xbf16> to vector<32x128xbf16>
    %cst_63 = arith.constant dense<0.000000e+00> : vector<8x128xf32>
    %218 = tpu.matmul %214, %217, %cst_63 {dimension_numbers = #tpu.dot_dimension_numbers<[1], [0], [0], [1], [0, 0, 1, 1], [], []>} : vector<8x32xbf16>, vector<32x128xbf16>, vector<8x128xf32> -> vector<8x128xf32>
    %c0_64 = arith.constant 0 : index
    %c0_65 = arith.constant 0 : index
    %c0_66 = arith.constant 0 : index
    %219 = vector.load %arg15[%c0_64, %c0_65, %c0_66] : memref<1x1x128xf32, #tpu.memory_space<vmem>>, vector<1x1x128xf32>
    %220 = vector.shape_cast %219 : vector<1x1x128xf32> to vector<1x128xf32>
    %221 = vector.broadcast %220 : vector<1x128xf32> to vector<8x128xf32>
    %222 = arith.addf %218, %221 : vector<8x128xf32>
    %cst_67 = arith.constant 5.000000e-01 : f32
    %223 = vector.broadcast %cst_67 : f32 to vector<8x128xf32>
    %224 = arith.mulf %223, %222 : vector<8x128xf32>
    %cst_68 = arith.constant 4.471500e-02 : f32
    %225 = vector.broadcast %cst_68 : f32 to vector<8x128xf32>
    %226 = arith.mulf %225, %222 : vector<8x128xf32>
    %227 = arith.mulf %226, %222 : vector<8x128xf32>
    %228 = arith.mulf %227, %222 : vector<8x128xf32>
    %229 = arith.addf %222, %228 : vector<8x128xf32>
    %cst_69 = arith.constant 0.797884583 : f32
    %230 = vector.broadcast %cst_69 : f32 to vector<8x128xf32>
    %231 = arith.mulf %230, %229 : vector<8x128xf32>
    %232 = math.tanh %231 : vector<8x128xf32>
    %cst_70 = arith.constant 1.000000e+00 : f32
    %233 = vector.broadcast %cst_70 : f32 to vector<8x128xf32>
    %234 = arith.addf %233, %232 : vector<8x128xf32>
    %235 = arith.mulf %224, %234 : vector<8x128xf32>
    %236 = arith.truncf %235 : vector<8x128xf32> to vector<8x128xbf16>
    %c0_71 = arith.constant 0 : index
    %c0_72 = arith.constant 0 : index
    %c0_73 = arith.constant 0 : index
    %237 = vector.load %arg16[%c0_71, %c0_72, %c0_73] : memref<1x128x32xbf16, #tpu.memory_space<vmem>>, vector<1x128x32xbf16>
    %238 = vector.shape_cast %237 : vector<1x128x32xbf16> to vector<128x32xbf16>
    %cst_74 = arith.constant dense<0.000000e+00> : vector<8x32xf32>
    %239 = tpu.matmul %236, %238, %cst_74 {dimension_numbers = #tpu.dot_dimension_numbers<[1], [0], [0], [1], [0, 0, 1, 1], [], []>} : vector<8x128xbf16>, vector<128x32xbf16>, vector<8x32xf32> -> vector<8x32xf32>
    %240 = arith.addf %215, %239 : vector<8x32xf32>
    %c0_75 = arith.constant 0 : index
    %c0_76 = arith.constant 0 : index
    %c0_77 = arith.constant 0 : index
    %241 = vector.load %arg17[%c0_75, %c0_76, %c0_77] : memref<1x1x32xf32, #tpu.memory_space<vmem>>, vector<1x1x32xf32>
    %242 = vector.shape_cast %241 : vector<1x1x32xf32> to vector<1x32xf32>
    %243 = vector.broadcast %242 : vector<1x32xf32> to vector<8x32xf32>
    %244 = arith.addf %240, %243 : vector<8x32xf32>
    %245 = arith.addf %213, %244 : vector<8x32xf32>
    %c0_78 = arith.constant 0 : index
    %c0_79 = arith.constant 0 : index
    %c0_80 = arith.constant 0 : index
    %246 = vector.load %arg12[%c0_78, %c0_79, %c0_80] : memref<1x1x32xf32, #tpu.memory_space<vmem>>, vector<1x1x32xf32>
    %247 = vector.shape_cast %246 : vector<1x1x32xf32> to vector<1x32xf32>
    %c0_81 = arith.constant 0 : index
    %c0_82 = arith.constant 0 : index
    %c0_83 = arith.constant 0 : index
    %248 = vector.load %arg13[%c0_81, %c0_82, %c0_83] : memref<1x1x32xf32, #tpu.memory_space<vmem>>, vector<1x1x32xf32>
    %249 = vector.shape_cast %248 : vector<1x1x32xf32> to vector<1x32xf32>
    %cst_84 = arith.constant dense<0.000000e+00> : vector<8xf32>
    %250 = vector.multi_reduction <add>, %245, %cst_84 [1] : vector<8x32xf32> to vector<8xf32>
    %251 = vector.shape_cast %250 : vector<8xf32> to vector<8x1xf32>
    %cst_85 = arith.constant 3.125000e-02 : f32
    %252 = vector.broadcast %cst_85 : f32 to vector<8x1xf32>
    %253 = arith.mulf %251, %252 : vector<8x1xf32>
    %254 = vector.broadcast %253 : vector<8x1xf32> to vector<8x32xf32>
    %255 = arith.subf %245, %254 : vector<8x32xf32>
    %256 = arith.mulf %255, %255 : vector<8x32xf32>
    %cst_86 = arith.constant dense<0.000000e+00> : vector<8xf32>
    %257 = vector.multi_reduction <add>, %256, %cst_86 [1] : vector<8x32xf32> to vector<8xf32>
    %258 = vector.shape_cast %257 : vector<8xf32> to vector<8x1xf32>
    %cst_87 = arith.constant 3.125000e-02 : f32
    %259 = vector.broadcast %cst_87 : f32 to vector<8x1xf32>
    %260 = arith.mulf %258, %259 : vector<8x1xf32>
    %cst_88 = arith.constant 9.99999974E-6 : f32
    %261 = vector.broadcast %cst_88 : f32 to vector<8x1xf32>
    %262 = arith.addf %260, %261 : vector<8x1xf32>
    %263 = math.rsqrt %262 : vector<8x1xf32>
    %264 = vector.broadcast %263 : vector<8x1xf32> to vector<8x32xf32>
    %265 = arith.mulf %255, %264 : vector<8x32xf32>
    %266 = vector.broadcast %247 : vector<1x32xf32> to vector<8x32xf32>
    %267 = arith.mulf %265, %266 : vector<8x32xf32>
    %268 = vector.broadcast %249 : vector<1x32xf32> to vector<8x32xf32>
    %269 = arith.addf %267, %268 : vector<8x32xf32>
    %c0_89 = arith.constant 0 : index
    %c0_90 = arith.constant 0 : index
    %270 = vector.load %arg21[%c0_89, %c0_90] : memref<8x32xf32, #tpu.memory_space<vmem>>, vector<8x32xf32>
    tpu.vector_store %arg21[%c0_89, %c0_90], %269 {strides = array<i32>} : memref<8x32xf32, #tpu.memory_space<vmem>>, vector<8x32xf32>,
    %c2_i32 = arith.constant 2 : i32
    %271 = arith.cmpi eq, %arg1, %c2_i32 : i32
    %272 = arith.extui %271 : i1 to i32
    %c0_i32_91 = arith.constant 0 : i32
    %273 = arith.cmpi ne, %272, %c0_i32_91 : i32
    scf.if %273 {
      %c0_92 = arith.constant 0 : index
      %c0_93 = arith.constant 0 : index
      %274 = vector.load %arg18[%c0_92, %c0_93] : memref<1x32xf32, #tpu.memory_space<vmem>>, vector<1x32xf32>
      %c0_94 = arith.constant 0 : index
      %c0_95 = arith.constant 0 : index
      %275 = vector.load %arg19[%c0_94, %c0_95] : memref<1x32xf32, #tpu.memory_space<vmem>>, vector<1x32xf32>
      %cst_96 = arith.constant dense<0.000000e+00> : vector<8xf32>
      %276 = vector.multi_reduction <add>, %269, %cst_96 [1] : vector<8x32xf32> to vector<8xf32>
      %277 = vector.shape_cast %276 : vector<8xf32> to vector<8x1xf32>
      %cst_97 = arith.constant 3.125000e-02 : f32
      %278 = vector.broadcast %cst_97 : f32 to vector<8x1xf32>
      %279 = arith.mulf %277, %278 : vector<8x1xf32>
      %280 = vector.broadcast %279 : vector<8x1xf32> to vector<8x32xf32>
      %281 = arith.subf %269, %280 : vector<8x32xf32>
      %282 = arith.mulf %281, %281 : vector<8x32xf32>
      %cst_98 = arith.constant dense<0.000000e+00> : vector<8xf32>
      %283 = vector.multi_reduction <add>, %282, %cst_98 [1] : vector<8x32xf32> to vector<8xf32>
      %284 = vector.shape_cast %283 : vector<8xf32> to vector<8x1xf32>
      %cst_99 = arith.constant 3.125000e-02 : f32
      %285 = vector.broadcast %cst_99 : f32 to vector<8x1xf32>
      %286 = arith.mulf %284, %285 : vector<8x1xf32>
      %cst_100 = arith.constant 9.99999974E-6 : f32
      %287 = vector.broadcast %cst_100 : f32 to vector<8x1xf32>
      %288 = arith.addf %286, %287 : vector<8x1xf32>
      %289 = math.rsqrt %288 : vector<8x1xf32>
      %290 = vector.broadcast %289 : vector<8x1xf32> to vector<8x32xf32>
      %291 = arith.mulf %281, %290 : vector<8x32xf32>
      %292 = vector.broadcast %274 : vector<1x32xf32> to vector<8x32xf32>
      %293 = arith.mulf %291, %292 : vector<8x32xf32>
      %294 = vector.broadcast %275 : vector<1x32xf32> to vector<8x32xf32>
      %295 = arith.addf %293, %294 : vector<8x32xf32>
      %296 = vector.shape_cast %295 : vector<8x32xf32> to vector<1x8x32xf32>
      %c0_101 = arith.constant 0 : index
      %c0_102 = arith.constant 0 : index
      %c0_103 = arith.constant 0 : index
      %297 = vector.load %arg20[%c0_101, %c0_102, %c0_103] : memref<1x8x32xf32, #tpu.memory_space<vmem>>, vector<1x8x32xf32>
      tpu.vector_store %arg20[%c0_101, %c0_102, %c0_103], %296 {strides = array<i32>} : memref<1x8x32xf32, #tpu.memory_space<vmem>>, vector<1x8x32xf32>,
    } else {
    }
    return
  }
  func.func @transform_0(%arg0: i32, %arg1: i32) -> (i32, i32, i32) {
    %c0_i32 = arith.constant 0 : i32
    %c0_i32_0 = arith.constant 0 : i32
    %c0_i32_1 = arith.constant 0 : i32
    return %arg0, %c0_i32, %c0_i32_0 : i32, i32, i32
  }
  func.func @transform_1(%arg0: i32, %arg1: i32) -> (i32, i32) {
    %c0_i32 = arith.constant 0 : i32
    %c0_i32_0 = arith.constant 0 : i32
    %c0_i32_1 = arith.constant 0 : i32
    return %c0_i32, %c0_i32_0 : i32, i32
  }
  func.func @transform_2(%arg0: i32, %arg1: i32) -> (i32, i32) {
    %c0_i32 = arith.constant 0 : i32
    %c0_i32_0 = arith.constant 0 : i32
    %c0_i32_1 = arith.constant 0 : i32
    return %c0_i32, %c0_i32_0 : i32, i32
  }
  func.func @transform_3(%arg0: i32, %arg1: i32) -> (i32, i32) {
    %c0_i32 = arith.constant 0 : i32
    %c0_i32_0 = arith.constant 0 : i32
    %c0_i32_1 = arith.constant 0 : i32
    return %c0_i32, %c0_i32_0 : i32, i32
  }
  func.func @transform_4(%arg0: i32, %arg1: i32) -> (i32, i32, i32) {
    %c0_i32 = arith.constant 0 : i32
    %c0_i32_0 = arith.constant 0 : i32
    %c0_i32_1 = arith.constant 0 : i32
    return %arg1, %c0_i32, %c0_i32_0 : i32, i32, i32
  }
  func.func @transform_5(%arg0: i32, %arg1: i32) -> (i32, i32, i32) {
    %c0_i32 = arith.constant 0 : i32
    %c0_i32_0 = arith.constant 0 : i32
    %c0_i32_1 = arith.constant 0 : i32
    return %arg1, %c0_i32, %c0_i32_0 : i32, i32, i32
  }
  func.func @transform_6(%arg0: i32, %arg1: i32) -> (i32, i32, i32) {
    %c0_i32 = arith.constant 0 : i32
    %c0_i32_0 = arith.constant 0 : i32
    %c0_i32_1 = arith.constant 0 : i32
    return %arg1, %c0_i32, %c0_i32_0 : i32, i32, i32
  }
  func.func @transform_7(%arg0: i32, %arg1: i32) -> (i32, i32, i32) {
    %c0_i32 = arith.constant 0 : i32
    %c0_i32_0 = arith.constant 0 : i32
    %c0_i32_1 = arith.constant 0 : i32
    return %arg1, %c0_i32, %c0_i32_0 : i32, i32, i32
  }
  func.func @transform_8(%arg0: i32, %arg1: i32) -> (i32, i32, i32) {
    %c0_i32 = arith.constant 0 : i32
    %c0_i32_0 = arith.constant 0 : i32
    %c0_i32_1 = arith.constant 0 : i32
    return %arg1, %c0_i32, %c0_i32_0 : i32, i32, i32
  }
  func.func @transform_9(%arg0: i32, %arg1: i32) -> (i32, i32, i32) {
    %c0_i32 = arith.constant 0 : i32
    %c0_i32_0 = arith.constant 0 : i32
    %c0_i32_1 = arith.constant 0 : i32
    return %arg1, %c0_i32, %c0_i32_0 : i32, i32, i32
  }
  func.func @transform_10(%arg0: i32, %arg1: i32) -> (i32, i32, i32) {
    %c0_i32 = arith.constant 0 : i32
    %c0_i32_0 = arith.constant 0 : i32
    %c0_i32_1 = arith.constant 0 : i32
    return %arg1, %c0_i32, %c0_i32_0 : i32, i32, i32
  }
  func.func @transform_11(%arg0: i32, %arg1: i32) -> (i32, i32, i32) {
    %c0_i32 = arith.constant 0 : i32
    %c0_i32_0 = arith.constant 0 : i32
    %c0_i32_1 = arith.constant 0 : i32
    return %arg1, %c0_i32, %c0_i32_0 : i32, i32, i32
  }
  func.func @transform_12(%arg0: i32, %arg1: i32) -> (i32, i32, i32) {
    %c0_i32 = arith.constant 0 : i32
    %c0_i32_0 = arith.constant 0 : i32
    %c0_i32_1 = arith.constant 0 : i32
    return %arg1, %c0_i32, %c0_i32_0 : i32, i32, i32
  }
  func.func @transform_13(%arg0: i32, %arg1: i32) -> (i32, i32, i32) {
    %c0_i32 = arith.constant 0 : i32
    %c0_i32_0 = arith.constant 0 : i32
    %c0_i32_1 = arith.constant 0 : i32
    return %arg1, %c0_i32, %c0_i32_0 : i32, i32, i32
  }
  func.func @transform_14(%arg0: i32, %arg1: i32) -> (i32, i32, i32) {
    %c0_i32 = arith.constant 0 : i32
    %c0_i32_0 = arith.constant 0 : i32
    %c0_i32_1 = arith.constant 0 : i32
    return %arg1, %c0_i32, %c0_i32_0 : i32, i32, i32
  }
  func.func @transform_15(%arg0: i32, %arg1: i32) -> (i32, i32, i32) {
    %c0_i32 = arith.constant 0 : i32
    %c0_i32_0 = arith.constant 0 : i32
    %c0_i32_1 = arith.constant 0 : i32
    return %arg1, %c0_i32, %c0_i32_0 : i32, i32, i32
  }
  func.func @transform_16(%arg0: i32, %arg1: i32) -> (i32, i32) {
    %c0_i32 = arith.constant 0 : i32
    %c0_i32_0 = arith.constant 0 : i32
    %c0_i32_1 = arith.constant 0 : i32
    return %c0_i32, %c0_i32_0 : i32, i32
  }
  func.func @transform_17(%arg0: i32, %arg1: i32) -> (i32, i32) {
    %c0_i32 = arith.constant 0 : i32
    %c0_i32_0 = arith.constant 0 : i32
    %c0_i32_1 = arith.constant 0 : i32
    return %c0_i32, %c0_i32_0 : i32, i32
  }
  func.func @transform_18(%arg0: i32, %arg1: i32) -> (i32, i32, i32) {
    %c0_i32 = arith.constant 0 : i32
    %c0_i32_0 = arith.constant 0 : i32
    %c0_i32_1 = arith.constant 0 : i32
    return %arg0, %c0_i32, %c0_i32_0 : i32, i32, i32
  }
}

</mosaic_0001>

<bundles_post_ra>
// kernel: tpu_custom_call.1
= control target key start
LH: loop header
LB: loop body
LE: loop exit
PB: predicated region body
PF: predicated region fallthrough
CT: control target
= control target key end

     0   :  { %s2708_s0 = inlined_call_operand.vmem [shape: f32[2,8,16], index: 0, kind: input, shape index: {}]   ;;  %s2709_s1 = inlined_call_operand.vmem [shape: f32[8,32], index: 1, kind: input, shape index: {}]   ;;  %s2710_s2 = inlined_call_operand.vmem [shape: bf16[16,32], index: 2, kind: input, shape index: {}]   ;;  %s2711_s3 = inlined_call_operand.vmem [shape: f32[1,32], index: 3, kind: input, shape index: {}]   ;;  %s2712_s4 = inlined_call_operand.vmem [shape: bf16[3,32,96], index: 4, kind: input, shape index: {}]   ;;  %s2713_s5 = inlined_call_operand.vmem [shape: f32[3,1,96], index: 5, kind: input, shape index: {}]   ;;  %s2714_s6 = inlined_call_operand.vmem [shape: bf16[3,32,32], index: 6, kind: input, shape index: {}]   ;;  %s2715_s7 = inlined_call_operand.vmem [shape: f32[3,1,32], index: 7, kind: input, shape index: {}]   ;;  %s2716_s8 = inlined_call_operand.vmem [shape: f32[3,1,32], index: 8, kind: input, shape index: {}]   ;;  %s2717_s9 = inlined_call_operand.vmem [shape: f32[3,1,32], index: 9, kind: input, shape index: {}]   ;;  %s2718_s10 = inlined_call_operand.vmem [shape: f32[3,1,32], index: 10, kind: input, shape index: {}]   ;;  %s2719_s11 = inlined_call_operand.vmem [shape: f32[3,1,32], index: 11, kind: input, shape index: {}]   ;;  %s2720_s12 = inlined_call_operand.vmem [shape: bf16[3,32,128], index: 12, kind: input, shape index: {}]   ;;  %s2721_s13 = inlined_call_operand.vmem [shape: f32[3,1,128], index: 13, kind: input, shape index: {}]   ;;  %s2722_s14 = inlined_call_operand.vmem [shape: bf16[3,128,32], index: 14, kind: input, shape index: {}]   ;;  %s2723_s15 = inlined_call_operand.vmem [shape: f32[3,1,32], index: 15, kind: input, shape index: {}]   ;;  %s2724_s16 = inlined_call_operand.vmem [shape: f32[1,32], index: 16, kind: input, shape index: {}]   ;;  %s2725_s17 = inlined_call_operand.vmem [shape: f32[1,32], index: 17, kind: input, shape index: {}]   ;;  %s2726_s18 = inlined_call_operand.hbm [shape: f32[2,8,32], index: 18, kind: output, shape index: {}]  }
   0x1   :  { %2744 = sst [smem:[#allocation21_spill]] %s2708_s0 }
   0x2   :  { %2745 = sst [smem:[#allocation22_spill]] %s2709_s1 }
   0x3   :  { %2746 = sst [smem:[#allocation23_spill]] %s2710_s2 }
   0x4   :  { %2747 = sst [smem:[#allocation24_spill]] %s2711_s3 }
   0x5   :  { %2748 = sst [smem:[#allocation25_spill]] %s2712_s4 }
   0x6   :  { %2749 = sst [smem:[#allocation26_spill]] %s2714_s6 }
   0x7   :  { %2750 = sst [smem:[#allocation27_spill]] %s2724_s16 }
   0x8   :  { %2751 = sst [smem:[#allocation28_spill]] %s2725_s17 }
   0x9   :  { %2752 = sst [smem:[#allocation29_spill]] %s2726_s18 }
   0xa   :  { %23 = vsyncpa [#allocation4], 0 }
   0xb   :  { %25 = vsyncpa [#allocation4 + $0x1], 0  ;;  %s2320_s27 = smov 0   ;;  %s2322_s28 = smov 0  }
   0xc   :  { %s2324_s29 = smov 0   ;;  %s2326_s30 = smov 0  }
   0xd   :  { %s2328_s0 = smov 0   ;;  %s2330_s19 = smov 0  }
   0xe   :  { %s2332_s1 = smov 0   ;;  %s2334_s20 = smov 0  }
   0xf LB: > { %2753 = sst [smem:[#allocation6_spill]] %s2165_s27  ;;  %s1827_s21 = sadd.s32 4294967295, %s2193_s20   ;;  %s2193_s20 = sphi %s2334_s20, %s31_s20   ;;  %s2189_s1 = sphi %s2332_s1, %s2801_s1   ;;  %s2185_s19 = sphi %s2330_s19, %s2800_s19   ;;  %s2181_s0 = sphi %s2328_s0, %s2799_s0   ;;  %s2177_s30 = sphi %s2326_s30, %s2798_s30   ;;  %s2173_s29 = sphi %s2324_s29, %s2797_s29   ;;  %s2169_s28 = sphi %s2322_s28, %s2796_s28   ;;  %s2165_s27 = sphi %s2320_s27, %s2795_s27  }
  0x10   : > { %2754 = sst [smem:[#allocation7_spill]] %s2169_s28  ;;  %s1828_s22 = sadd.s32 4294967294, %s2193_s20  }
  0x11   : > { %2755 = sst [smem:[#allocation8_spill]] %s2173_s29  ;;  %s40_s2 = sadd.s32 1, %s2185_s19 }
  0x12   : > { %2756 = sst [smem:[#allocation9_spill]] %s2177_s30  ;;  %p41_p0 = scmp.ge.s32.totalorder %s40_s2, 3 }
  0x13   : > { %2757 = sst [smem:[#allocation10_spill]] %s2181_s0  ;;  %s43_s23 = sadd.s32 1, %s2189_s1 }
  0x14   : > { %2758 = sst [smem:[#allocation11_spill]] %s2185_s19  ;;  %p503_p1 = scmp.ne.s32.totalorder %s2173_s29, %s2169_s28 }
  0x15   : > { %2759 = sst [smem:[#allocation12_spill]] %s2189_s1  ;;  %p504_p2 = scmp.eq.s32.totalorder %s1827_s21, 5 }
  0x16   : > { %2760 = sst [smem:[#allocation13_spill]] %s2193_s20  ;;  %s2803_s2 = smov (%p41_p0, %s40_s2), 0 }
  0x17   : > { %2761 = sst [smem:[#allocation14_spill]] %s2803_s2  ;;  %s2805_s23 = smov (!%p41_p0, %s43_s23), %s2189_s1 }
  0x18   : > { %p2369_p3 = por %p504_p2, %p503_p1  ;;  %p509_p4 = scmp.ne.s32.totalorder %s2169_s28, %s2165_s27 }
  0x19   : > { %p45_p5 = scmp.ge.s32.totalorder %s2805_s23, 2  ;;  %p510_p6 = scmp.eq.s32.totalorder %s1828_s22, 5 }
  0x1a   : > { %s2762_s24 = scalar_select %p2369_p3, 1, 0 }
  0x1b   : > { %p1831_p7 = scmp.ge.s32.totalorder %s2193_s20, 1  ;;  %p630_p8 = scmp.lt.s32.totalorder %s2193_s20, 7 }
  0x1c   : > { %2763 = sst [smem:[#allocation15_spill]] %s2762_s24  ;;  %s2807_s23 = smov (%p45_p5, %s2805_s23), 0 }
  0x1d   : > { %2764 = sst [smem:[#allocation16_spill]] %s2807_s23  ;;  %p2379_p9 = por %p510_p6, %p509_p4 }
  0x1e   : > { %p631_p10 = pnand %p1831_p7, %p630_p8  ;;  %s490_s26 = ssub.s32 %s2189_s1, %s2807_s23 }
  0x1f   : > { %s2765_s25 = scalar_select %p2379_p9, 1, 0 }
  0x20   : > { %s493_s21 = sadd.s32 1, %s2173_s29  ;;  %p491_p11 = scmp.eq.s32.totalorder %s490_s26, 0 }
  0x21   : > { %2766 = sst [smem:[#allocation17_spill]] %s2765_s25  ;;  %634 = sbr.rel (%p631_p10) target bundleno = 2876 (0xb3c), region = 92 }
  0x22   : > { %s2387_s2 = scalar_select %p491_p11, %s2173_s29, %s493_s21  }
  0x24   : > { %2767 = sst [smem:[#allocation18_spill]] %s2387_s2 }
  0x26   : > { %s2732_s22 = sand.u32 1, %s2169_s28   ;;  %p727_p12 = scmp.lt.s32.totalorder %s2181_s0, 1 }
  0x27   : > { %s2393_s19 = sshll.u32 %s2732_s22, 3  ;;  %p731_p13 = scmp.lt.s32.totalorder %s2177_s30, 2 }
  0x28   : > { %s728_s25 = scalar_select %p727_p12, %s2181_s0, 1 }
  0x29   : > { %s2398_s27 = scalar_select %p731_p13, %s2177_s30, 2 }
  0x2a   : > { %s1833_s26 = sshll.u32 %s728_s25, 3  ;;  %s2768_s1 = sld [smem:[#allocation21_spill]] }
  0x2b   : > { %s1928_s2 = sshll.u32 %s2398_s27, 4  ;;  %s2769_s4 = sld [smem:[#allocation25_spill]] }
  0x2c   : > { %s2771_s6 = sld [smem:[#allocation26_spill]]  ;;  %s746_s23 = scalar_lea.vmem %s2715_s7, %s2398_s27 }
  0x2d   : > { %s758_s17 = scalar_lea.vmem %s2719_s11, %s2398_s27  ;;  %s2441_s30 = scalar_lea.vmem %s2720_s12, %s1928_s2 }
  0x2e   : > { %s1931_s21 = sshll.u32 %s2398_s27, 6  ;;  %s726_s0 = scalar_lea.vmem [#allocation3], %s2393_s19 }
  0x2f   : > { %s2455_s24 = scalar_lea.vmem %s2722_s14, %s1931_s21  ;;  %s2773_s16 = sld [smem:[#allocation9_spill]] }
  0x30   : > { %s730_s22 = scalar_lea.vmem %s2768_s1, %s1833_s26  ;;  %s766_s26 = scalar_lea.vmem %s2721_s13, %s2398_s27 }
  0x31   : > { %s2407_s18 = scalar_lea.vmem %s2769_s4, %s1928_s2  ;;  %s774_s4 = scalar_lea.vmem %s2723_s15, %s2398_s27 }
  0x32   : > { %2770 = sst [smem:[#allocation19_spill]] %s2407_s18  ;;  %s2416_s3 = scalar_lea.vmem %s2771_s6, %s1928_s2 }
  0x33   : > { %2772 = sst [smem:[#allocation20_spill]] %s2416_s3 }
  0x35   : > { %p1842_p0 = scmp.ne.s32.totalorder %s2773_s16, 0 }
  0x36   : > { %s2774_s2 = sld [smem:[#allocation23_spill]] (!%p1842_p0) }
  0x37   : > { %779 = sbr.rel (%p1842_p0) target bundleno = 198 (0xc6), region = 96  ;;  %s2775_s29 = sld [smem:[#allocation24_spill]] (!%p1842_p0) }
  0x38   : > { %s2776_s18 = sld [smem:[#allocation22_spill]] (!%p1842_p0) }
  0x3c   : > { %v1932_v0 = vld [vmem:[%s2774_s2] sm:$0xff]  ;;  %vm794_vm0 = vcmask 130048   ;;  %vm813_vm1 = vcmask 261120  }
  0x3d   : > { %v780_v1 = vld [vmem:[%s730_s22] sm:$0xff]  ;;  %805 = vmatpush.bf16.msra.mxu0 %v1932_v0 }
  0x3e   : > { %v781_v2 = vpack.c.bf16 %v780_v1, %v780_v1  ;;  %v2048_v3 = vld [vmem:[%s2775_s29] ss:$0 sm:$0xff] }
  0x3f   : > { %v811_v5 = vld [vmem:[%s2776_s18] sm:$0xff] }
  0x40   : > { %1847 = vmatmul.msk.bf16.vlgmr.msra.gmra.mxu0 %vm794_vm0, %v781_v2 }
  0xbd   : > { %v807_v4 = vpop.f32.mrf.mxu0 }
  0xbe   : > { %v808_v6 = vadd.f32 %v2048_v3, %v807_v4 }
  0xc0   : > { %v812_v7 = vadd.f32 %v811_v5, %v808_v6 }
  0xc2   : > { %814 = vst.msk [vmem:[#allocation2] sm:$0xff] %vm813_vm1, %v812_v7 }
  0xc5   : > { %v809_v8 = vpop.f32.mrf.mxu0 }
  0xc6 PF: > { %s2777_s22 = sld [smem:[#allocation19_spill]]  ;;  %vm837_vm2 = vcmask 261120   ;;  %s2778_s3 = scalar_lea.vmem %s2713_s5, %s2398_s27  ;;  %vm862_vm3 = vcmask 31744   ;;  %vm900_vm4 = vcmask 1043456   ;;  %vm882_vm5 = vcmask 64512  }
  0xc7   : > { %v2049_v13 = vld [vmem:[%s2778_s3] ss:$0 sm:$0xff]  ;;  %s2195_s6 = smov 92   ;;  %s2196_s2 = smov 64   ;;  %vm1342_vm6 = vcmask 97280   ;;  %vm1344_vm7 = vcmask 130048  }
  0xc8   : > { %s2197_s25 = smov 96   ;;  %s2198_s1 = smov 124   ;;  %vm1346_vm8 = vcmask 162816   ;;  %vm1348_vm9 = vcmask 195584   ;;  %vm1350_vm10 = vcmask 228352  }
  0xc9   : > { %v2470_v11 = vld [vmem:[#allocation2] sm:$0xff]  ;;  %s2199_s29 = smov 84   ;;  %s2200_s21 = smov 116  }
  0xca   : > { %v816_v12 = vpack.c.bf16 %v2470_v11, %v2470_v11  ;;  %s2201_s20 = smov 88   ;;  %s2202_s18 = smov 120  }
  0xcb   : > { %s2204_s28 = smov 100   ;;  %s2205_s16 = smov 104  }
  0xcc   : > { %v1934_v9 = vld [vmem:[%s2777_s22 + $0x8] sm:$0xff]  ;;  %v1933_v10 = vld [vmem:[%s2777_s22] sm:$0xff]  ;;  %s2203_s22 = smov 80   ;;  %s2206_s3 = smov 112  }
  0xcd   : > { %847 = vmatpush.bf16.msra.mxu0 %v1934_v9 }
  0xd1   : > { %848 = vmatpush.bf16.msra.mxu0 %v1933_v10 }
  0xd4   : > { %1856 = vmatmul.msk.bf16.vlgmr.msra.gmra.mxu0 %vm837_vm2, %v816_v12 }
 0x151   : > { %v850_v14 = vpop.f32.mrf.mxu0 }
 0x152   : > { %v851_v15 = vadd.f32 %v2049_v13, %v850_v14 }
 0x154   : > { %v854_v16 = vmul.f32 0.5, %v851_v15  ;;  %v856_v17 = vpack.c.bf16 %v851_v15, %v851_v15 }
 0x156   : > { %v858_v18 = vunpack.c.l.b16 %v856_v17  ;;  %v855_v19 = vpack.c.bf16 %v854_v16, %v854_v16 }
 0x158   : > { %v2480_v20 = vpack.c.b16 %v858_v18, %v858_v18  ;;  %v918_v22 = vunpack.c.l.b16 %v855_v19 }
 0x159   : > { %v852_v21 = vpop.f32.mrf.mxu0 }
 0x15a   : > { %922 = vrot.lane.b32.xlu2 %v2480_v20, %s2195_s6  ;;  %895 = vrot.lane.b32.xlu1 %v2480_v20, %s2196_s2  ;;  %v2485_v23 = vpack.c.b16 %v918_v22, %v918_v22  ;;  %s2207_s6 = smov 76   ;;  %s2208_s2 = smov 108  }
 0x15b   : > { %860 = vrot.lane.b32.xlu0 %v2480_v20, %s2197_s25  ;;  %s2209_s25 = smov 68  }
 0x162   : > { %920 = vrot.lane.b32.xlu2 %v2485_v23, %s2198_s1  ;;  %s2210_s1 = smov 72  }
 0x16a   : > { %1034 = vrot.lane.b32.xlu2 %v2480_v20, %s2199_s29  ;;  %s2211_s29 = smov 52  }
 0x172   : > { %1032 = vrot.lane.b32.xlu2 %v2485_v23, %s2200_s21  ;;  %s2212_s21 = smov 56  }
 0x17a   : > { %978 = vrot.lane.b32.xlu2 %v2480_v20, %s2201_s20  ;;  %s2213_s20 = smov 60  }
 0x182   : > { %976 = vrot.lane.b32.xlu2 %v2485_v23, %s2202_s18  ;;  %s2214_s18 = smov 44  }
 0x18a   : > { %1090 = vrot.lane.b32.xlu2 %v2480_v20, %s2203_s22  ;;  %s2215_s22 = smov 40  }
 0x192   : > { %1256 = vrot.lane.b32.xlu2 %v2485_v23, %s2204_s28  ;;  %s2216_s28 = smov 36  }
 0x19a   : > { %1200 = vrot.lane.b32.xlu2 %v2485_v23, %s2205_s16  ;;  %s2217_s16 = smov 48  }
 0x1b4   : > { %v923_v24 = vpop.permute.xlu2 %922 }
 0x1b5   : > { %v928_v33 = vsel %vm862_vm3, %v923_v24, 0 }
 0x1bc   : > { %v2495_v25 = vpop.permute.xlu2 %920 }
 0x1c4   : > { %v1035_v26 = vpop.permute.xlu2 %1034 }
 0x1c5   : > { %v1040_v27 = vsel %vm862_vm3, %v1035_v26, 0 }
 0x1c6   : > { %1049 = vmatpush.bf16.xpose.msra.mxu3 %v1040_v27 }
 0x1cc   : > { %v896_v28 = vpop.permute.xlu1 %895  ;;  %v1033_v29 = vpop.permute.xlu2 %1032 }
 0x1cd   : > { %v861_v30 = vpop.permute.xlu0 %860  ;;  %1863 = vmatmul.msk.bf16.vlgmr.msra.gmra.mxu3 %vm862_vm3, %v1033_v29  ;;  %v902_v31 = vsel %vm900_vm4, %v896_v28, 0 }
 0x1ce   : > { %v867_v32 = vsel %vm862_vm3, %v861_v30, 0  ;;  %911 = vmatpush.bf16.msra.mxu2 %v902_v31 }
 0x1cf   : > { %876 = vmatpush.bf16.xpose.msra.mxu1 %v867_v32 }
 0x1d2   : > { %937 = vmatpush.bf16.xpose.msrb.mxu2 %v928_v33 }
 0x1d4   : > { %v979_v34 = vpop.permute.xlu2 %978 }
 0x1d5   : > { %v984_v35 = vsel %vm862_vm3, %v979_v34, 0 }
 0x1d6   : > { %1857 = vmatmul.msk.bf16.vlgmr.msra.gmra.mxu1 %vm862_vm3, %v855_v19  ;;  %993 = vmatpush.bf16.xpose.msrb.mxu0 %v984_v35 }
 0x1dc   : > { %v977_v36 = vpop.permute.xlu2 %976 }
 0x1dd   : > { %1861 = vmatmul.msk.bf16.vlgmr.msrb.gmra.mxu0 %vm862_vm3, %v977_v36 }
 0x1e4   : > { %v1091_v37 = vpop.permute.xlu2 %1090 }
 0x1e5   : > { %v1096_v38 = vsel %vm862_vm3, %v1091_v37, 0 }
 0x1e6   : > { %1105 = vmatpush.bf16.xpose.msra.mxu0 %v1096_v38 }
 0x1ec   : > { %v1257_v2 = vpop.permute.xlu2 %1256 }
 0x1f4   : > { %v1201_v5 = vpop.permute.xlu2 %1200 }
 0x250   : > { %v2506_v39 = vpop.f32.mrf.mxu3 }
 0x251   : > { %v1055_v47 = vsel %vm882_vm5, %v2506_v39, -inf }
 0x253   : > { %v878_v40 = vpop.f32.mrf.mxu1 }
 0x254   : > { %v883_v41 = vsel %vm882_vm5, %v878_v40, -inf }
 0x255   : > { %884 = vmax.xlane.f32.xlu0 %v883_v41 }
 0x258   : > { %v1053_v42 = vpop.f32.mrf.mxu3 }
 0x25a   : > { %v2509_v43 = vpop.f32.mrf.mxu0 }
 0x25b   : > { %v880_v44 = vpop.f32.mrf.mxu1  ;;  %v999_v45 = vsel %vm882_vm5, %v2509_v43, -inf }
 0x25c   : > { %1000 = vmax.xlane.f32.xlu2 %v999_v45 }
 0x262   : > { %v997_v46 = vpop.f32.mrf.mxu0 }
 0x269   : > { %1088 = vrot.lane.b32.xlu0 %v2485_v23, %s2206_s3  ;;  %s2218_s3 = smov 8  }
 0x293   : > { %1056 = vmax.xlane.f32.xlu0 %v1055_v47 }
 0x2c8   : > { %v885_v48 = vpop.xlane.xlu0 %884 }
 0x2c9   : > { %v886_v49 = vsub.f32 %v878_v40, %v885_v48 }
 0x2cb   : > { %v887_v50 = vmul.f32 1.442695, %v886_v49 }
 0x2cd   : > { %2057 = vpow2.f32 %v887_v50 }
 0x2cf   : > { %v1001_v24 = vpop.xlane.xlu2 %1000 }
 0x2d3   : > { %v2058_v51 = vpop.eup %2057 }
 0x2d4   : > { %v889_v52 = vsel %vm882_vm5, %v2058_v51, 0.0 }
 0x2d5   : > { %890 = vadd.xlane.f32.xlu1 %v889_v52 }
 0x2db   : > { %v1089_v53 = vpop.permute.xlu0 %1088 }
 0x2dc   : > { %1865 = vmatmul.msk.bf16.vlgmr.msra.gmra.mxu0 %vm862_vm3, %v1089_v53 }
 0x2ee   : > { %1146 = vrot.lane.b32.xlu1 %v2480_v20, %s2207_s6  ;;  %s2219_s6 = smov 4  }
 0x2f6   : > { %1144 = vrot.lane.b32.xlu1 %v2485_v23, %s2208_s2  ;;  %s2220_s2 = smov 16  }
 0x2fe   : > { %1258 = vrot.lane.b32.xlu1 %v2480_v20, %s2209_s25  ;;  %s2221_s25 = smov 12  }
 0x306   : > { %1202 = vrot.lane.b32.xlu1 %v2480_v20, %s2210_s1  ;;  %v1057_v21 = vpop.xlane.xlu0 %1056  ;;  %s2779_s1 = sld [smem:[#allocation20_spill]] }
 0x307   : > { %v1058_v22 = vsub.f32 %v2506_v39, %v1057_v21 }
 0x309   : > { %v1059_v23 = vmul.f32 1.442695, %v1058_v22 }
 0x348   : > { %v891_v54 = vpop.xlane.xlu1 %890 }
 0x349   : > { %2059 = vrcp.f32 %v891_v54 }
 0x34a   : > { %2061 = vpow2.f32 %v1059_v23 }
 0x34f   : > { %v2060_v55 = vpop.eup %2059 }
 0x350   : > { %v893_v56 = vmul.f32 %v2060_v55, %v2058_v51  ;;  %v2547_v26 = vpop.eup %2061 }
 0x351   : > { %v1061_v28 = vsel %vm882_vm5, %v2547_v26, 0.0 }
 0x352   : > { %v894_v57 = vpack.c.bf16 %v893_v56, %v893_v56 }
 0x354   : > { %1858 = vmatmul.msk.bf16.vlgmr.msra.gmra.mxu2 %vm882_vm5, %v894_v57 }
 0x359   : > { %v1107_v58 = vpop.f32.mrf.mxu0 }
 0x35a   : > { %v1111_v59 = vsel %vm882_vm5, %v1107_v58, -inf }
 0x35b   : > { %1112 = vmax.xlane.f32.xlu0 %v1111_v59 }
 0x360   : > { %v1147_v60 = vpop.permute.xlu1 %1146 }
 0x361   : > { %v1109_v61 = vpop.f32.mrf.mxu0  ;;  %v1152_v62 = vsel %vm862_vm3, %v1147_v60, 0 }
 0x362   : > { %1161 = vmatpush.bf16.xpose.msrb.mxu3 %v1152_v62 }
 0x364   : > { %1859 = vmatmul.msk.bf16.vlgmr.msrb.gmra.mxu2 %vm862_vm3, %v2495_v25  ;;  %v1002_v25 = vsub.f32 %v2509_v43, %v1001_v24 }
 0x366   : > { %v1003_v27 = vmul.f32 1.442695, %v1002_v25 }
 0x368   : > { %v1145_v63 = vpop.permute.xlu1 %1144  ;;  %2063 = vpow2.f32 %v1003_v27 }
 0x369   : > { %1867 = vmatmul.msk.bf16.vlgmr.msrb.gmra.mxu3 %vm862_vm3, %v1145_v63 }
 0x36e   : > { %v2064_v33 = vpop.eup %2063 }
 0x36f   : > { %v1005_v34 = vsel %vm882_vm5, %v2064_v33, 0.0 }
 0x370   : > { %v1259_v0 = vpop.permute.xlu1 %1258 }
 0x371   : > { %v1264_v1 = vsel %vm862_vm3, %v1259_v0, 0 }
 0x372   : > { %1273 = vmatpush.bf16.xpose.msra.mxu3 %v1264_v1 }
 0x378   : > { %v1203_v3 = vpop.permute.xlu1 %1202 }
 0x379   : > { %v1208_v4 = vsel %vm862_vm3, %v1203_v3, 0  ;;  %1871 = vmatmul.msk.bf16.vlgmr.msra.gmra.mxu3 %vm862_vm3, %v1257_v2 }
 0x37a   : > { %1217 = vmatpush.bf16.xpose.msrb.mxu0 %v1208_v4 }
 0x381   : > { %1869 = vmatmul.msk.bf16.vlgmr.msrb.gmra.mxu0 %vm862_vm3, %v1201_v5 }
 0x3ce   : > { %v1113_v29 = vpop.xlane.xlu0 %1112 }
 0x3cf   : > { %v1114_v30 = vsub.f32 %v1107_v58, %v1113_v29 }
 0x3d1   : > { %v1115_v31 = vmul.f32 1.442695, %v1114_v30 }
 0x3d3   : > { %2065 = vpow2.f32 %v1115_v31 }
 0x3d7   : > { %v2532_v6 = vpop.f32.mrf.mxu2 }
 0x3d9   : > { %v2554_v35 = vpop.eup %2065 }
 0x3da   : > { %v1117_v36 = vsel %vm882_vm5, %v2554_v35, 0.0 }
 0x3df   : > { %v915_v7 = vpop.f32.mrf.mxu2 }
 0x3e7   : > { %v2534_v8 = vpop.f32.mrf.mxu2 }
 0x3e8   : > { %v943_v32 = vsel %vm882_vm5, %v2534_v8, -inf }
 0x3ec   : > { %v1163_v9 = vpop.f32.mrf.mxu3 }
 0x3ed   : > { %v1167_v10 = vsel %vm882_vm5, %v1163_v9, -inf }
 0x3ee   : > { %1168 = vmax.xlane.f32.xlu1 %v1167_v10 }
 0x3ef   : > { %v941_v12 = vpop.f32.mrf.mxu2 }
 0x3f4   : > { %v1165_v13 = vpop.f32.mrf.mxu3 }
 0x3fc   : > { %v2537_v14 = vpop.f32.mrf.mxu3 }
 0x3fd   : > { %v1279_v15 = vsel %vm882_vm5, %v2537_v14, -inf }
 0x3fe   : > { %1280 = vmax.xlane.f32.xlu2 %v1279_v15  ;;  %v1219_v16 = vpop.f32.mrf.mxu0 }
 0x3ff   : > { %v1223_v17 = vsel %vm882_vm5, %v1219_v16, -inf }
 0x400   : > { %1224 = vmax.xlane.f32.xlu0 %v1223_v17 }
 0x404   : > { %v1277_v18 = vpop.f32.mrf.mxu3 }
 0x406   : > { %v1221_v19 = vpop.f32.mrf.mxu0 }
 0x407   : > { %1067 = vrot.lane.b32.xlu1 %v2480_v20, %s2211_s29  ;;  %s2222_s29 = smov 24  }
 0x414   : > { %1011 = vrot.lane.b32.xlu0 %v2480_v20, %s2212_s21  ;;  %s2223_s21 = smov 20  }
 0x416   : > { %955 = vrot.lane.b32.xlu2 %v2480_v20, %s2213_s20  ;;  %s2224_s20 = smov 28  }
 0x431   : > { %1062 = vadd.xlane.f32.xlu1 %v1061_v28 }
 0x439   : > { %944 = vmax.xlane.f32.xlu1 %v943_v32 }
 0x43e   : > { %1006 = vadd.xlane.f32.xlu0 %v1005_v34 }
 0x446   : > { %1118 = vadd.xlane.f32.xlu0 %v1117_v36 }
 0x452   : > { %1179 = vrot.lane.b32.xlu1 %v2480_v20, %s2214_s18  ;;  %s2783_s18 = sld [smem:[#allocation9_spill]] }
 0x458   : > { %p1923_p1 = scmp.ne.s32.totalorder %s2783_s18, 2 }
 0x45a   : > { %1235 = vrot.lane.b32.xlu0 %v2480_v20, %s2215_s22  ;;  %s2784_s22 = sld [smem:[#allocation27_spill]] (!%p1923_p1) }
 0x461   : > { %v1169_v37 = vpop.xlane.xlu1 %1168 }
 0x462   : > { %v1170_v38 = vsub.f32 %v1163_v9, %v1169_v37 }
 0x464   : > { %v1171_v39 = vmul.f32 1.442695, %v1170_v38 }
 0x466   : > { %2067 = vpow2.f32 %v1171_v39 }
 0x46c   : > { %v2560_v40 = vpop.eup %2067 }
 0x46d   : > { %v1173_v41 = vsel %vm882_vm5, %v2560_v40, 0.0 }
 0x46e   : > { %1174 = vadd.xlane.f32.xlu2 %v1173_v41 }
 0x471   : > { %v1281_v42 = vpop.xlane.xlu2 %1280 }
 0x472   : > { %v1282_v0 = vsub.f32 %v2537_v14, %v1281_v42 }
 0x473   : > { %v1225_v43 = vpop.xlane.xlu0 %1224 }
 0x474   : > { %v1226_v44 = vsub.f32 %v1219_v16, %v1225_v43  ;;  %v1283_v1 = vmul.f32 1.442695, %v1282_v0 }
 0x476   : > { %v1227_v45 = vmul.f32 1.442695, %v1226_v44 }
 0x478   : > { %2069 = vpow2.f32 %v1227_v45 }
 0x479   : > { %v956_v46 = vpop.permute.xlu2 %955  ;;  %v1068_v47 = vpop.permute.xlu1 %1067 }
 0x47a   : > { %v961_v48 = vsel %vm900_vm4, %v956_v46, 0  ;;  %v1073_v49 = vsel %vm900_vm4, %v1068_v47, 0 }
 0x47b   : > { %970 = vmatpush.bf16.msra.mxu2 %v961_v48 }
 0x47e   : > { %v2566_v50 = vpop.eup %2069 }
 0x47f   : > { %1082 = vmatpush.bf16.msrb.mxu2 %v1073_v49  ;;  %v1229_v51 = vsel %vm882_vm5, %v2566_v50, 0.0 }
 0x480   : > { %1230 = vadd.xlane.f32.xlu2 %v1229_v51  ;;  %v1936_v51 = vld [vmem:[%s2779_s1 + $0x8] sm:$0xff] }
 0x481   : > { %1382 = vmatpush.bf16.msra.mxu0 %v1936_v51 }
 0x486   : > { %v1012_v52 = vpop.permute.xlu0 %1011 }
 0x487   : > { %v1017_v53 = vsel %vm900_vm4, %v1012_v52, 0  ;;  %v1935_v52 = vld [vmem:[%s2779_s1] sm:$0xff] }
 0x488   : > { %1026 = vmatpush.bf16.msrb.mxu1 %v1017_v53  ;;  %1383 = vmatpush.bf16.msra.mxu0 %v1935_v52 }
 0x498   : > { %1291 = vrot.lane.b32.xlu2 %v2480_v20, %s2216_s28  ;;  %s2780_s28 = scalar_lea.vmem %s2716_s8, %s2398_s27 }
 0x4a4   : > { %v1063_v54 = vpop.xlane.xlu1 %1062 }
 0x4ac   : > { %v945_v55 = vpop.xlane.xlu1 %944 }
 0x4ad   : > { %v946_v56 = vsub.f32 %v2534_v8, %v945_v55 }
 0x4af   : > { %v947_v57 = vmul.f32 1.442695, %v946_v56 }
 0x4b1   : > { %2071 = vpow2.f32 %v947_v57  ;;  %v1007_v58 = vpop.xlane.xlu0 %1006 }
 0x4b2   : > { %2073 = vrcp.f32 %v1007_v58 }
 0x4b3   : > { %2075 = vpow2.f32 %v1283_v1 }
 0x4b7   : > { %v2072_v59 = vpop.eup %2071 }
 0x4b8   : > { %v2074_v60 = vpop.eup %2073  ;;  %v949_v61 = vsel %vm882_vm5, %v2072_v59, 0.0 }
 0x4b9   : > { %v1009_v62 = vmul.f32 %v2074_v60, %v2064_v33  ;;  %950 = vadd.xlane.f32.xlu1 %v949_v61  ;;  %v2076_v2 = vpop.eup %2075  ;;  %v1119_v12 = vpop.xlane.xlu0 %1118 }
 0x4ba   : > { %v1285_v3 = vsel %vm882_vm5, %v2076_v2, 0.0 }
 0x4bb   : > { %v1010_v63 = vpack.c.bf16 %v1009_v62, %v1009_v62 }
 0x4bd   : > { %1862 = vmatmul.msk.bf16.vlgmr.msrb.gmra.mxu1 %vm882_vm5, %v1010_v63 }
 0x4c4   : > { %v1180_v4 = vpop.permute.xlu1 %1179 }
 0x4c5   : > { %v1185_v13 = vsel %vm900_vm4, %v1180_v4, 0 }
 0x4cc   : > { %v1236_v21 = vpop.permute.xlu0 %1235 }
 0x4cd   : > { %v1241_v27 = vsel %vm900_vm4, %v1236_v21, 0 }
 0x4d2   : > { %1123 = vrot.lane.b32.xlu1 %v2480_v20, %s2217_s16 }
 0x4e1   : > { %v1175_v8 = vpop.xlane.xlu2 %1174 }
 0x4f3   : > { %v1231_v14 = vpop.xlane.xlu2 %1230 }
 0x4fb   : > { %v1292_v23 = vpop.permute.xlu2 %1291 }
 0x4fc   : > { %1286 = vadd.xlane.f32.xlu1 %v1285_v3  ;;  %v1297_v29 = vsel %vm900_vm4, %v1292_v23, 0 }
 0x52c   : > { %v951_v5 = vpop.xlane.xlu1 %950 }
 0x52d   : > { %2077 = vrcp.f32 %v951_v5 }
 0x52e   : > { %2079 = vrcp.f32 %v1063_v54 }
 0x52f   : > { %2081 = vrcp.f32 %v1119_v12 }
 0x530   : > { %2083 = vrcp.f32 %v1175_v8 }
 0x531   : > { %2085 = vrcp.f32 %v1231_v14 }
 0x533   : > { %v2078_v7 = vpop.eup %2077 }
 0x534   : > { %v953_v9 = vmul.f32 %v2078_v7, %v2072_v59  ;;  %v2080_v15 = vpop.eup %2079 }
 0x535   : > { %v2082_v16 = vpop.eup %2081  ;;  %v1065_v17 = vmul.f32 %v2080_v15, %v2547_v26  ;;  %v1938_v15 = vld [vmem:[%s2441_s30 + $0x8] sm:$0xff] }
 0x536   : > { %v954_v10 = vpack.c.bf16 %v953_v9, %v953_v9  ;;  %v1121_v19 = vmul.f32 %v2082_v16, %v2554_v35  ;;  %v2084_v26 = vpop.eup %2083  ;;  %v1937_v16 = vld [vmem:[%s2441_s30] sm:$0xff] }
 0x537   : > { %v1066_v25 = vpack.c.bf16 %v1065_v17, %v1065_v17  ;;  %v2086_v30 = vpop.eup %2085  ;;  %v1177_v31 = vmul.f32 %v2084_v26, %v2560_v40  ;;  %v1946_v17 = vld [vmem:[%s2455_s24 + $0x38] sm:$0xff] }
 0x538   : > { %1860 = vmatmul.msk.bf16.vlgmr.msra.gmra.mxu2 %vm882_vm5, %v954_v10  ;;  %v1122_v28 = vpack.c.bf16 %v1121_v19, %v1121_v19  ;;  %v1233_v32 = vmul.f32 %v2086_v30, %v2566_v50  ;;  %1537 = vmatpush.bf16.msrb.mxu3 %v1946_v17  ;;  %v1945_v19 = vld [vmem:[%s2455_s24 + $0x30] sm:$0xff] }
 0x539   : > { %1194 = vmatpush.bf16.msra.mxu2 %v1185_v13  ;;  %v1178_v33 = vpack.c.bf16 %v1177_v31, %v1177_v31 }
 0x53a   : > { %v1028_v20 = vpop.f32.mrf.mxu1  ;;  %v1234_v34 = vpack.c.bf16 %v1233_v32, %v1233_v32 }
 0x53b   : > { %1317 = vrot.lane.b32.xlu0 %v1028_v20, %s2218_s3 }
 0x53c   : > { %1538 = vmatpush.bf16.msrb.mxu3 %v1945_v19 }
 0x542   : > { %v1030_v18 = vpop.f32.mrf.mxu1 }
 0x544   : > { %v1124_v22 = vpop.permute.xlu1 %1123 }
 0x545   : > { %v1129_v24 = vsel %vm900_vm4, %v1124_v22, 0 }
 0x546   : > { %1138 = vmatpush.bf16.msra.mxu1 %v1129_v24 }
 0x548   : > { %1864 = vmatmul.msk.bf16.vlgmr.msrb.gmra.mxu2 %vm882_vm5, %v1066_v25 }
 0x549   : > { %1306 = vmatpush.bf16.msrb.mxu2 %v1297_v29  ;;  %1866 = vmatmul.msk.bf16.vlgmr.msra.gmra.mxu1 %vm882_vm5, %v1122_v28  ;;  %v2051_v29 = vld [vmem:[%s2780_s28] ss:$0 sm:$0xff]  ;;  %s2785_s28 = sld [smem:[#allocation28_spill]] (!%p1923_p1) }
 0x54a   : > { %1250 = vmatpush.bf16.msrb.mxu1 %v1241_v27 }
 0x54e   : > { %1452 = vmatpush.bf16.msra.mxu1 %v1938_v15 }
 0x552   : > { %1453 = vmatpush.bf16.msra.mxu1 %v1937_v16 }
 0x558   : > { %1868 = vmatmul.msk.bf16.vlgmr.msra.gmra.mxu2 %vm882_vm5, %v1178_v33 }
 0x559   : > { %1870 = vmatmul.msk.bf16.vlgmr.msrb.gmra.mxu1 %vm882_vm5, %v1234_v34 }
 0x56f   : > { %v1287_v35 = vpop.xlane.xlu1 %1286 }
 0x570   : > { %2087 = vrcp.f32 %v1287_v35  ;;  %v1944_v35 = vld [vmem:[%s2455_s24 + $0x28] sm:$0xff] }
 0x571   : > { %1539 = vmatpush.bf16.msrb.mxu3 %v1944_v35 }
 0x576   : > { %v2088_v36 = vpop.eup %2087 }
 0x577   : > { %v1289_v37 = vmul.f32 %v2088_v36, %v2076_v2  ;;  %v1943_v36 = vld [vmem:[%s2455_s24 + $0x20] sm:$0xff] }
 0x578   : > { %1540 = vmatpush.bf16.msrb.mxu3 %v1943_v36 }
 0x579   : > { %v1290_v38 = vpack.c.bf16 %v1289_v37, %v1289_v37  ;;  %v1942_v37 = vld [vmem:[%s2455_s24 + $0x18] sm:$0xff] }
 0x57b   : > { %1872 = vmatmul.msk.bf16.vlgmr.msrb.gmra.mxu2 %vm882_vm5, %v1290_v38  ;;  %v1941_v38 = vld [vmem:[%s2455_s24 + $0x10] sm:$0xff] }
 0x57c   : > { %1541 = vmatpush.bf16.msrb.mxu3 %v1942_v37 }
 0x580   : > { %1542 = vmatpush.bf16.msrb.mxu3 %v1941_v38 }
 0x5ad   : > { %v1318_v53 = vpop.permute.xlu0 %1317 }
 0x5bb   : > { %v972_v39 = vpop.f32.mrf.mxu2 }
 0x5bc   : > { %1313 = vrot.lane.b32.xlu1 %v972_v39, %s2219_s6  ;;  %s2781_s6 = scalar_lea.vmem %s2717_s9, %s2398_s27  ;;  %v1940_v39 = vld [vmem:[%s2455_s24 + $0x8] sm:$0xff] }
 0x5bd   : > { %v2052_v30 = vld [vmem:[%s2781_s6] ss:$0 sm:$0xff]  ;;  %1543 = vmatpush.bf16.msrb.mxu3 %v1940_v39 }
 0x5c3   : > { %v974_v41 = vpop.f32.mrf.mxu2 }
 0x5c4   : > { %v1939_v41 = vld [vmem:[%s2455_s24] sm:$0xff] }
 0x5c5   : > { %1544 = vmatpush.bf16.msrb.mxu3 %v1939_v41 }
 0x5c6   : > { %v1140_v40 = vpop.f32.mrf.mxu1 }
 0x5c7   : > { %1325 = vrot.lane.b32.xlu0 %v1140_v40, %s2220_s2  ;;  %v2053_v40 = vld [vmem:[%s766_s26] ss:$0 sm:$0xff] }
 0x5cb   : > { %v1084_v42 = vpop.f32.mrf.mxu2 }
 0x5cc   : > { %1321 = vrot.lane.b32.xlu2 %v1084_v42, %s2221_s25 }
 0x5ce   : > { %v1142_v43 = vpop.f32.mrf.mxu1 }
 0x5d3   : > { %v1086_v44 = vpop.f32.mrf.mxu2 }
 0x5d6   : > { %v1252_v45 = vpop.f32.mrf.mxu1 }
 0x5d7   : > { %1333 = vrot.lane.b32.xlu0 %v1252_v45, %s2222_s29  ;;  %s2782_s29 = scalar_lea.vmem %s2718_s10, %s2398_s27 }
 0x5db   : > { %v1196_v46 = vpop.f32.mrf.mxu2 }
 0x5dc   : > { %1329 = vrot.lane.b32.xlu2 %v1196_v46, %s2223_s21 }
 0x5de   : > { %v1254_v47 = vpop.f32.mrf.mxu1 }
 0x5e3   : > { %v1198_v48 = vpop.f32.mrf.mxu2 }
 0x5fe   : > { %v1308_v49 = vpop.f32.mrf.mxu2 }
 0x5ff   : > { %1337 = vrot.lane.b32.xlu2 %v1308_v49, %s2224_s20 }
 0x606   : > { %v1310_v50 = vpop.f32.mrf.mxu2 }
 0x626   : > { %v1322_v54 = vpop.permute.xlu2 %1321 }
 0x62e   : > { %v1314_v55 = vpop.permute.xlu1 %1313 }
 0x62f   : > { %v1340_v56 = vsel %vm862_vm3, %v2532_v6, %v1314_v55  ;;  %v2050_v6 = vld [vmem:[%s746_s23] ss:$0 sm:$0xff] }
 0x630   : > { %v1341_v58 = vsel %vm882_vm5, %v1340_v56, %v1318_v53  ;;  %v2054_v55 = vld [vmem:[%s774_s4] ss:$0 sm:$0xff] }
 0x631   : > { %v1343_v60 = vsel %vm1342_vm6, %v1341_v58, %v1322_v54 }
 0x636   : > { %v1330_v59 = vpop.permute.xlu2 %1329 }
 0x639   : > { %v1326_v57 = vpop.permute.xlu0 %1325 }
 0x63a   : > { %v1345_v61 = vsel %vm1344_vm7, %v1343_v60, %v1326_v57 }
 0x63b   : > { %v1347_v63 = vsel %vm1346_vm8, %v1345_v61, %v1330_v59 }
 0x649   : > { %v1334_v62 = vpop.permute.xlu0 %1333 }
 0x64a   : > { %v1349_v0 = vsel %vm1348_vm9, %v1347_v63, %v1334_v62 }
 0x659   : > { %v1338_v1 = vpop.permute.xlu2 %1337 }
 0x65a   : > { %v1351_v2 = vsel %vm1350_vm10, %v1349_v0, %v1338_v1 }
 0x65b   : > { %v1352_v3 = vpack.c.bf16 %v1351_v2, %v1351_v2 }
 0x65d   : > { %1881 = vmatmul.msk.bf16.vlgmr.msra.gmra.mxu0 %vm837_vm2, %v1352_v3 }
 0x6da   : > { %v1385_v4 = vpop.f32.mrf.mxu0 }
 0x6db   : > { %v1386_v5 = vadd.f32 %v2050_v6, %v1385_v4 }
 0x6dd   : > { %v1389_v7 = vadd.f32 %v1386_v5, %v2470_v11 }
 0x6df   : > { %v1392_v8 = vsel %vm837_vm2, %v1389_v7, 0.0 }
 0x6e0   : > { %1393 = vadd.xlane.f32.xlu1 %v1392_v8 }
 0x6e2   : > { %v1387_v9 = vpop.f32.mrf.mxu0 }
 0x753   : > { %v1394_v10 = vpop.xlane.xlu1 %1393 }
 0x754   : > { %v1395_v12 = vmul.f32 0.03125, %v1394_v10 }
 0x756   : > { %v1396_v13 = vsub.f32 %v1389_v7, %v1395_v12  ;;  %v2055_v12 = vld [vmem:[%s2782_s29] ss:$0 sm:$0xff] }
 0x758   : > { %v1397_v20 = vmul.f32 %v1396_v13, %v1396_v13 }
 0x75a   : > { %v1398_v14 = vsel %vm837_vm2, %v1397_v20, 0.0  ;;  %v2056_v20 = vld [vmem:[%s758_s17] ss:$0 sm:$0xff] }
 0x75b   : > { %1399 = vadd.xlane.f32.xlu0 %v1398_v14 }
 0x7ce   : > { %v1400_v18 = vpop.xlane.xlu0 %1399 }
 0x7cf   : > { %v1401_v11 = vmul.f32 0.03125, %v1400_v18 }
 0x7d1   : > { %v1402_v21 = vadd.f32 1e-05, %v1401_v11 }
 0x7d3   : > { %2089 = vrsqrt.f32 %v1402_v21  ;;  %vm1409_vm12 = vweird.f32 %v1402_v21 }
 0x7d9   : > { %v2090_v22 = vpop.eup %2089 }
 0x7da   : > { %v1404_v23 = vmul.f32 %v2090_v22, %v1402_v21  ;;  %vm1410_vm11 = vweird.f32 %v2090_v22 }
 0x7db   : > { %vm1411_vm13 = vmor %vm1409_vm12, %vm1410_vm11 }
 0x7dc   : > { %v1405_v24 = vmul.f32 %v2090_v22, %v1404_v23 }
 0x7de   : > { %v1406_v25 = vmul.f32 0.5, %v1405_v24 }
 0x7e0   : > { %v1407_v27 = vsub.f32 1.5, %v1406_v25 }
 0x7e2   : > { %v1408_v28 = vmul.f32 %v2090_v22, %v1407_v27 }
 0x7e4   : > { %v1412_v26 = vsel %vm1411_vm13, %v2090_v22, %v1408_v28 }
 0x7e5   : > { %v1413_v31 = vmul.f32 %v1412_v26, %v1396_v13 }
 0x7e7   : > { %v1417_v32 = vmul.f32 %v2051_v29, %v1413_v31 }
 0x7e9   : > { %v1421_v33 = vadd.f32 %v2052_v30, %v1417_v32 }
 0x7eb   : > { %v1422_v34 = vpack.c.bf16 %v1421_v33, %v1421_v33 }
 0x7ed   : > { %1890 = vmatmul.msk.bf16.vlgmr.msra.gmra.mxu1 %vm837_vm2, %v1422_v34 }
 0x86a   : > { %v1455_v42 = vpop.f32.mrf.mxu1 }
 0x86b   : > { %v1456_v43 = vadd.f32 %v2053_v40, %v1455_v42 }
 0x86d   : > { %v1460_v44 = vmul.f32 0.044715, %v1456_v43  ;;  %v1459_v51 = vmul.f32 0.5, %v1456_v43 }
 0x86f   : > { %v1461_v45 = vmul.f32 %v1460_v44, %v1456_v43 }
 0x871   : > { %v1462_v46 = vmul.f32 %v1461_v45, %v1456_v43 }
 0x872   : > { %v1457_v47 = vpop.f32.mrf.mxu1 }
 0x873   : > { %v1463_v48 = vadd.f32 %v1462_v46, %v1456_v43 }
 0x875   : > { %v1464_v49 = vmul.f32 0.7978846, %v1463_v48 }
 0x877   : > { %2091 = vtanh.f32 %v1464_v49 }
 0x87d   : > { %v2092_v50 = vpop.eup %2091 }
 0x87e   : > { %v1466_v52 = vadd.f32 1.0, %v2092_v50 }
 0x880   : > { %v1467_v53 = vmul.f32 %v1466_v52, %v1459_v51 }
 0x882   : > { %v1468_v54 = vpack.c.bf16 %v1467_v53, %v1467_v53 }
 0x884   : > { %1545 = vmatmul.bf16.vlgmr.msrb.gmra.mxu3 %v1468_v54 }
 0x907   : > { %v1546_v56 = vpop.f32.mrf.mxu3 }
 0x908   : > { %v1547_v57 = vadd.f32 %v2054_v55, %v1546_v56 }
 0x90a   : > { %v1550_v58 = vadd.f32 %v1547_v57, %v1421_v33 }
 0x90c   : > { %v1553_v59 = vsel %vm837_vm2, %v1550_v58, 0.0 }
 0x90d   : > { %1554 = vadd.xlane.f32.xlu2 %v1553_v59 }
 0x90f   : > { %v1548_v60 = vpop.f32.mrf.mxu3 }
 0x980   : > { %v1555_v61 = vpop.xlane.xlu2 %1554 }
 0x981   : > { %v1556_v62 = vmul.f32 0.03125, %v1555_v61 }
 0x983   : > { %v1557_v63 = vsub.f32 %v1550_v58, %v1556_v62 }
 0x985   : > { %v1558_v0 = vmul.f32 %v1557_v63, %v1557_v63 }
 0x987   : > { %v1559_v1 = vsel %vm837_vm2, %v1558_v0, 0.0 }
 0x988   : > { %1560 = vadd.xlane.f32.xlu1 %v1559_v1 }
 0x9fb   : > { %v1561_v2 = vpop.xlane.xlu1 %1560 }
 0x9fc   : > { %v1562_v3 = vmul.f32 0.03125, %v1561_v2 }
 0x9fe   : > { %v1563_v6 = vadd.f32 1e-05, %v1562_v3 }
 0xa00   : > { %2093 = vrsqrt.f32 %v1563_v6  ;;  %vm1570_vm15 = vweird.f32 %v1563_v6 }
 0xa06   : > { %v2094_v4 = vpop.eup %2093 }
 0xa07   : > { %v1565_v5 = vmul.f32 %v2094_v4, %v1563_v6  ;;  %vm1571_vm14 = vweird.f32 %v2094_v4 }
 0xa08   : > { %vm1572_vm0 = vmor %vm1570_vm15, %vm1571_vm14 }
 0xa09   : > { %v1566_v7 = vmul.f32 %v2094_v4, %v1565_v5 }
 0xa0b   : > { %v1567_v8 = vmul.f32 0.5, %v1566_v7 }
 0xa0d   : > { %v1568_v9 = vsub.f32 1.5, %v1567_v8 }
 0xa0f   : > { %v1569_v10 = vmul.f32 %v2094_v4, %v1568_v9 }
 0xa11   : > { %v1573_v13 = vsel %vm1572_vm0, %v2094_v4, %v1569_v10 }
 0xa12   : > { %v1574_v14 = vmul.f32 %v1573_v13, %v1557_v63 }
 0xa14   : > { %v1578_v15 = vmul.f32 %v2055_v12, %v1574_v14  ;;  %1587 = sbr.rel (%p1923_p1) target bundleno = 2854 (0xb26), region = 100 }
 0xa16   : > { %v1582_v16 = vadd.f32 %v2056_v20, %v1578_v15 }
 0xa18   : > { %1583 = vst.msk [vmem:[#allocation2] sm:$0xff] %vm837_vm2, %v1582_v16 }
 0xa19   : > { %v1590_v17 = vsel %vm837_vm2, %v1582_v16, 0.0  ;;  %v2095_v32 = vld [vmem:[%s2784_s22] ss:$0 sm:$0xff] }
 0xa1a   : > { %1591 = vadd.xlane.f32.xlu0 %v1590_v17  ;;  %v2096_v35 = vld [vmem:[%s2785_s28] ss:$0 sm:$0xff] }
 0xa8d   : > { %v1592_v18 = vpop.xlane.xlu0 %1591 }
 0xa8e   : > { %v1593_v11 = vmul.f32 0.03125, %v1592_v18 }
 0xa90   : > { %v1594_v19 = vsub.f32 %v1582_v16, %v1593_v11 }
 0xa92   : > { %v1595_v21 = vmul.f32 %v1594_v19, %v1594_v19 }
 0xa94   : > { %v1596_v22 = vsel %vm837_vm2, %v1595_v21, 0.0 }
 0xa95   : > { %1597 = vadd.xlane.f32.xlu0 %v1596_v22 }
 0xb08   : > { %v1598_v23 = vpop.xlane.xlu0 %1597 }
 0xb09   : > { %v1599_v24 = vmul.f32 0.03125, %v1598_v23 }
 0xb0b   : > { %v1600_v25 = vadd.f32 1e-05, %v1599_v24 }
 0xb0d   : > { %2097 = vrsqrt.f32 %v1600_v25  ;;  %vm1607_vm3 = vweird.f32 %v1600_v25 }
 0xb13   : > { %v2098_v27 = vpop.eup %2097 }
 0xb14   : > { %v1602_v28 = vmul.f32 %v2098_v27, %v1600_v25  ;;  %vm1608_vm1 = vweird.f32 %v2098_v27 }
 0xb15   : > { %vm1609_vm4 = vmor %vm1607_vm3, %vm1608_vm1 }
 0xb16   : > { %v1603_v29 = vmul.f32 %v2098_v27, %v1602_v28 }
 0xb18   : > { %v1604_v26 = vmul.f32 0.5, %v1603_v29 }
 0xb1a   : > { %v1605_v30 = vsub.f32 1.5, %v1604_v26 }
 0xb1c   : > { %v1606_v31 = vmul.f32 %v2098_v27, %v1605_v30 }
 0xb1e   : > { %v1610_v33 = vsel %vm1609_vm4, %v2098_v27, %v1606_v31 }
 0xb1f   : > { %v1611_v34 = vmul.f32 %v1610_v33, %v1594_v19 }
 0xb21   : > { %v1615_v36 = vmul.f32 %v2095_v32, %v1611_v34 }
 0xb23   : > { %v1619_v37 = vadd.f32 %v2096_v35, %v1615_v36 }
 0xb25   : > { %1620 = vst.msk [vmem:[%s726_s0] sm:$0xff] %vm837_vm2, %v1619_v37 }
 0xb26 PF: > { %s2786_s16 = sld [smem:[#allocation10_spill]]  ;;  %s1634_s29 = sshll.u32 %s726_s0, 4  ;;  %s1635_s29 = int_to_ptr.vmem [resolvable:$true] %s1634_s29 }
 0xb27   : > { %s2787_s3 = sld [smem:[#allocation7_spill]] }
 0xb28   : > { %s2789_s1 = sld [smem:[#allocation29_spill]] }
 0xb2c   : > { %s1925_s2 = sshll.u32 %s2786_s16, 3 }
 0xb2d   : > { %s2791_s20 = sand.u32 1, %s2787_s3  }
 0xb2e   : > { %s2790_s4 = smov %s2789_s1  ;;  %s1632_s26 = scalar_lea.hbm %s2789_s1, %s1925_s2 }
 0xb2f   : > { %s1636_s21 = sshll.u32 %s1632_s26, 4  ;;  %s1622_s18 = scalar_lea.sflag [#allocation4], %s2791_s20  ;;  %s1637_s21 = int_to_ptr.hbm [resolvable:$true] %s1636_s21 }
 0xb30   : > { %s2113_s27 = sshra.s32 %s1637_s21, 4  ;;  %s2119_s30 = scalar_lea.hbm %s2790_s4, 16  ;;  %s2114_s27 = int_to_ptr.hbm [resolvable:$true] %s2113_s27 }
 0xb31   : > { %s2115_s17 = scalar_lea.hbm %s2114_s27, 8  ;;  %p2120_p6 = scmp.lt.s32.totalorder %s2114_s27, %s2790_s4 }
 0xb32   : > { %p2116_p2 = scmp.ne.s32.totalorder %s2114_s27, %s2115_s17  ;;  %p2121_p7 = scmp.lt.s32.totalorder %s2119_s30, %s2115_s17 }
 0xb34   : > { %p2117_p4 = pnand %p2116_p2, %p2369_p3  ;;  %p2122_p8 = por %p2121_p7, %p2120_p6 }
 0xb36   : > { %p2118_p5 = pneg %p2117_p4 }
 0xb38   : > { %p2123_p10 = pnand %p2122_p8, %p2118_p5 }
 0xb3a   : > { %2126 = shalt.err (!%p2123_p10)
}
 0xb3b   : > { %1947 = dma.vmem_to_hbm [thread:$0]  (%p2369_p3), %s1635_s29, 128, %s1637_s21, %s1622_s18  }
 0xb3c PF: > { %s2792_s19 = sld [smem:[#allocation13_spill]] }
 0xb3d   : > { %s2793_s0 = sld [smem:[#allocation6_spill]] }
 0xb42   : > { %p1953_p11 = scmp.ge.s32.totalorder %s2792_s19, 2 }
 0xb43   : > { %s1648_s2 = sand.u32 1, %s2793_s0  }
 0xb44   : > { %p1950_p12 = pnand %p1953_p11, %p2379_p9  ;;  %s1649_s25 = scalar_lea.sflag [#allocation4], %s1648_s2 }
 0xb46   : > { %p1951_p13 = pneg %p1950_p12 }
 0xb48   : > { %2160 = dma.done.wait (%p1951_p13), %s1649_s25, 128  }
 0xb49   : > { %2162 = vsyncadd (%p1951_p13), %s1649_s25, 4294967168  ;;  %s31_s20 = sadd.s32 1, %s2792_s19   ;;  %s2795_s27 = sld [smem:[#allocation7_spill]] }
 0xb4a   : > { %p28_p0 = scmp.ge.s32.totalorder %s31_s20, 8   ;;  %s2796_s28 = sld [smem:[#allocation8_spill]] }
 0xb4b   : > { %s2797_s29 = sld [smem:[#allocation18_spill]] }
 0xb4c   : > { %s2798_s30 = sld [smem:[#allocation11_spill]]  ;;  %30 = sbr.rel (!%p28_p0) target bundleno = 15 (0xf), region = 171 }
 0xb4d   : > { %s2799_s0 = sld [smem:[#allocation12_spill]] }
 0xb4e   : > { %s2800_s19 = sld [smem:[#allocation14_spill]] }
 0xb4f   : > { %s2801_s1 = sld [smem:[#allocation16_spill]] }
 0xb51   :  { %1655 = vsyncpa [#allocation4], 1 }
 0xb52   :  { %1657 = vsyncpa [#allocation4 + $0x1], 1 }

</bundles_post_ra>
